<compile_context>
chip_gen: v7x
topology: tpu7x:2x2x1
jax: 0.10.0
libtpu: 0.0.40
codegen_flags: <defaults>
</compile_context>

<pallas_src>
import functools

import jax
import jax.numpy as jnp
from jax import lax
from jax.experimental import pallas as pl
from jax.experimental.pallas import tpu as pltpu


def _silu(v):
    return v * (1.0 / (1.0 + jnp.exp(-v)))


def _bottleneck_kernel(x_ref, w1_ref, b1_ref, w2_ref, b2_ref, mask_ref, o_ref,
                       *, h, w, c1, c_mid, c2, add):
    hw = h * w
    xb = x_ref[0]                                   # (c1, hw), lane-dense

    # ---- cv1: 1x1 conv + folded BN + SiLU (per mid channel) -----------------
    y1 = []
    for d in range(c_mid):
        acc = jnp.zeros((1, hw), jnp.float32) + b1_ref[d]
        for ci in range(c1):
            acc = acc + w1_ref[d, ci] * xb[ci:ci + 1, :]
        y1.append(_silu(acc))

    # ---- shifted + masked taps of y1 for the 3x3 window ---------------------
    # taps[d][t] == y1[d] shifted by (dy, dx) with zero padding, t = (dy+1)*3+(dx+1)
    taps = [[None] * 9 for _ in range(c_mid)]
    t = 0
    for dy in (-1, 0, 1):
        for dx in (-1, 0, 1):
            k = dy * w + dx
            if k == 0:
                for d in range(c_mid):
                    taps[d][t] = y1[d]
            else:
                m = mask_ref[t:t + 1, :]            # (1, hw) 0/1 boundary mask
                for d in range(c_mid):
                    taps[d][t] = pltpu.roll(y1[d], (-k) % hw, 1) * m
            t += 1

    # ---- cv2: 3x3 conv + folded BN + SiLU (+ residual), per out channel -----
    for e in range(c2):
        acc = jnp.zeros((1, hw), jnp.float32) + b2_ref[e]
        for d in range(c_mid):
            base = d * 9
            for tt in range(9):
                acc = acc + w2_ref[e, base + tt] * taps[d][tt]
        y2 = _silu(acc)
        if add:
            y2 = y2 + xb[e:e + 1, :]
        o_ref[0, e:e + 1, :] = y2.astype(o_ref.dtype)


def _fold_bn(wt, gamma, beta, mean, var, eps):
    scale = gamma / jnp.sqrt(var + eps)
    return wt * scale[:, None, None, None], beta - mean * scale


def bottleneck_forward(x, params, *, shortcut=True, eps=1e-5):
    """Fused Pallas Bottleneck forward.  x: (b, c1, h, w) NCHW float32."""
    b, c1, h, w = x.shape
    w1, g1, be1, m1, v1 = params["cv1"]
    w2, g2, be2, m2, v2 = params["cv2"]
    c_mid = w1.shape[0]
    c2 = w2.shape[0]
    add = bool(shortcut and (c1 == c2))
    hw = h * w

    # Fold inference BatchNorm into the conv weights / biases.
    w1f, b1f = _fold_bn(w1, g1, be1, m1, v1, eps)            # (c_,c1,1,1),(c_,)
    w2f, b2f = _fold_bn(w2, g2, be2, m2, v2, eps)            # (c2,c_,3,3),(c2,)
    w1k = w1f.reshape(c_mid, c1).astype(jnp.float32)         # (c_, c1)
    w2k = w2f.reshape(c2, c_mid * 9).astype(jnp.float32)     # tap idx = d*9+ky*3+kx
    b1k = b1f.astype(jnp.float32)
    b2k = b2f.astype(jnp.float32)

    # Precompute the 9 zero-padding boundary masks on the flattened h*w axis.
    idx = jnp.arange(hw, dtype=jnp.int32)
    row = idx // w
    col = idx % w
    masks = []
    for dy in (-1, 0, 1):
        for dx in (-1, 0, 1):
            valid = ((row + dy) >= 0) & ((row + dy) < h) & \
                    ((col + dx) >= 0) & ((col + dx) < w)
            masks.append(valid)
    mask_arr = jnp.stack(masks).astype(jnp.float32)          # (9, hw)

    xf = x.reshape(b, c1, hw)                                # free NCHW view

    flops = 2 * b * hw * (c1 * c_mid + 9 * c_mid * c2) + b * hw * c2
    transcendentals = b * hw * (c_mid + c2)
    bytes_accessed = 4 * (b * c1 * hw + b * c2 * hw + 9 * hw
                          + w1k.size + w2k.size + b1k.size + b2k.size)

    out = pl.pallas_call(
        functools.partial(_bottleneck_kernel, h=h, w=w, c1=c1,
                          c_mid=c_mid, c2=c2, add=add),
        out_shape=jax.ShapeDtypeStruct((b, c2, hw), x.dtype),
        grid=(b,),
        in_specs=[
            pl.BlockSpec((1, c1, hw), lambda bi: (bi, 0, 0)),
            pl.BlockSpec(memory_space=pltpu.MemorySpace.SMEM),   # w1 scalars
            pl.BlockSpec(memory_space=pltpu.MemorySpace.SMEM),   # b1 scalars
            pl.BlockSpec(memory_space=pltpu.MemorySpace.SMEM),   # w2 scalars
            pl.BlockSpec(memory_space=pltpu.MemorySpace.SMEM),   # b2 scalars
            pl.BlockSpec((9, hw), lambda bi: (0, 0)),            # boundary masks
        ],
        out_specs=pl.BlockSpec((1, c2, hw), lambda bi: (bi, 0, 0)),
        compiler_params=pltpu.CompilerParams(
            dimension_semantics=("parallel",)),
        cost_estimate=pl.CostEstimate(flops=flops,
                                      transcendentals=transcendentals,
                                      bytes_accessed=bytes_accessed),
    )(xf, w1k, b1k, w2k, b2k, mask_arr)

    return out.reshape(b, c2, h, w)


# ----------------------------- pure-JAX reference -----------------------------
def _conv_bn_silu_ref(x, wt, gamma, beta, mean, var, eps, pad):
    y = lax.conv_general_dilated(
        x, wt, window_strides=(1, 1), padding=((pad, pad), (pad, pad)),
        dimension_numbers=("NCHW", "OIHW", "NCHW"),
        precision=lax.Precision.HIGHEST)
    s = gamma / jnp.sqrt(var + eps)
    y = y * s[None, :, None, None] + (beta - mean * s)[None, :, None, None]
    return _silu(y)


def bottleneck_ref(x, params, *, shortcut=True, eps=1e-5):
    w1, g1, be1, m1, v1 = params["cv1"]
    w2, g2, be2, m2, v2 = params["cv2"]
    c1, c2 = x.shape[1], w2.shape[0]
    y = _conv_bn_silu_ref(x, w1, g1, be1, m1, v1, eps, pad=0)
    y = _conv_bn_silu_ref(y, w2, g2, be2, m2, v2, eps, pad=1)
    return x + y if (shortcut and c1 == c2) else y


def _make_params(key, c1, c2, e=0.5):
    c_mid = int(c2 * e)
    ks = jax.random.split(key, 10)
    w1 = jax.random.normal(ks[0], (c_mid, c1, 1, 1), jnp.float32) * 0.5
    g1 = 1.0 + 0.1 * jax.random.normal(ks[1], (c_mid,), jnp.float32)
    be1 = 0.1 * jax.random.normal(ks[2], (c_mid,), jnp.float32)
    m1 = 0.1 * jax.random.normal(ks[3], (c_mid,), jnp.float32)
    v1 = jax.random.uniform(ks[4], (c_mid,), jnp.float32, minval=0.5, maxval=1.5)
    w2 = jax.random.normal(ks[5], (c2, c_mid, 3, 3), jnp.float32) * 0.3
    g2 = 1.0 + 0.1 * jax.random.normal(ks[6], (c2,), jnp.float32)
    be2 = 0.1 * jax.random.normal(ks[7], (c2,), jnp.float32)
    m2 = 0.1 * jax.random.normal(ks[8], (c2,), jnp.float32)
    v2 = jax.random.uniform(ks[9], (c2,), jnp.float32, minval=0.5, maxval=1.5)
    return {"cv1": (w1, g1, be1, m1, v1), "cv2": (w2, g2, be2, m2, v2)}


if __name__ == "__main__":
    key = jax.random.PRNGKey(0)
    kx, kp, kx2, kp2 = jax.random.split(key, 4)

    # Bottleneck(c1=4, c2=4, shortcut=True, k=(1, 3), e=0.5)  -> residual path
    x = jax.random.normal(kx, (2, 4, 16, 16), jnp.float32)
    params = _make_params(kp, 4, 4)
    y = jax.block_until_ready(bottleneck_forward(x, params, shortcut=True))
    y_ref = bottleneck_ref(x, params, shortcut=True)
    assert y.shape == (2, 4, 16, 16) and y.dtype == x.dtype
    assert jnp.allclose(y, y_ref, atol=1e-3, rtol=1e-3), \
        float(jnp.max(jnp.abs(y - y_ref)))

    # Bottleneck(c1=4, c2=6) -> c1 != c2, exercises the no-residual path
    x2 = jax.random.normal(kx2, (1, 4, 16, 16), jnp.float32)
    params2 = _make_params(kp2, 4, 6)
    y2 = jax.block_until_ready(bottleneck_forward(x2, params2, shortcut=True))
    y2_ref = bottleneck_ref(x2, params2, shortcut=True)
    assert y2.shape == (1, 6, 16, 16)
    assert jnp.allclose(y2, y2_ref, atol=1e-3, rtol=1e-3), \
        float(jnp.max(jnp.abs(y2 - y2_ref)))

    print("KERNEL_OK")
</pallas_src>

<mosaic_0001>
module attributes {stable_mosaic.version = 11 : i64} {
  func.func @_bottleneck_kernel(%arg0: i32, %arg1: memref<1x4x256xf32, #tpu.memory_space<vmem>>, %arg2: memref<2x4xf32, #tpu.memory_space<smem>>, %arg3: memref<2xf32, #tpu.memory_space<smem>>, %arg4: memref<4x18xf32, #tpu.memory_space<smem>>, %arg5: memref<4xf32, #tpu.memory_space<smem>>, %arg6: memref<9x256xf32, #tpu.memory_space<vmem>>, %arg7: memref<1x4x256xf32, #tpu.memory_space<vmem>>) attributes {dimension_semantics = [#tpu.dimension_semantics<parallel>], iteration_bounds = array<i64: 2>, scalar_prefetch = 0 : i64, scratch_operands = 0 : i64, tpu.core_type = #tpu.core_type<tc>, window_params = [{transform_indices = @transform_0, window_bounds = array<i64: 1, 4, 256>}, {transform_indices = @transform_1, window_bounds = array<i64: 2, 4>}, {transform_indices = @transform_2, window_bounds = array<i64: 2>}, {transform_indices = @transform_3, window_bounds = array<i64: 4, 18>}, {transform_indices = @transform_4, window_bounds = array<i64: 4>}, {pipeline_mode = #tpu.pipeline_mode<synchronous>, transform_indices = @transform_5, window_bounds = array<i64: 9, 256>}, {transform_indices = @transform_6, window_bounds = array<i64: 1, 4, 256>}]} {
    %c0 = arith.constant 0 : index
    %c0_0 = arith.constant 0 : index
    %c0_1 = arith.constant 0 : index
    %0 = vector.load %arg1[%c0, %c0_0, %c0_1] : memref<1x4x256xf32, #tpu.memory_space<vmem>>, vector<1x4x256xf32>
    %1 = vector.shape_cast %0 : vector<1x4x256xf32> to vector<4x256xf32>
    %cst = arith.constant 0.000000e+00 : f32
    %2 = vector.broadcast %cst : f32 to vector<1x256xf32>
    %c0_2 = arith.constant 0 : index
    %3 = memref.load %arg3[%c0_2] : memref<2xf32, #tpu.memory_space<smem>>
    %4 = vector.broadcast %3 : f32 to vector<1x256xf32>
    %5 = arith.addf %2, %4 : vector<1x256xf32>
    %c0_3 = arith.constant 0 : index
    %c0_4 = arith.constant 0 : index
    %6 = memref.load %arg2[%c0_3, %c0_4] : memref<2x4xf32, #tpu.memory_space<smem>>
    %7 = vector.extract_strided_slice %1 {offsets = [0, 0], sizes = [1, 256], strides = [1, 1]} : vector<4x256xf32> to vector<1x256xf32>
    %8 = vector.broadcast %6 : f32 to vector<1x256xf32>
    %9 = arith.mulf %8, %7 : vector<1x256xf32>
    %10 = arith.addf %5, %9 : vector<1x256xf32>
    %c0_5 = arith.constant 0 : index
    %c1 = arith.constant 1 : index
    %11 = memref.load %arg2[%c0_5, %c1] : memref<2x4xf32, #tpu.memory_space<smem>>
    %12 = vector.extract_strided_slice %1 {offsets = [1, 0], sizes = [1, 256], strides = [1, 1]} : vector<4x256xf32> to vector<1x256xf32>
    %13 = vector.broadcast %11 : f32 to vector<1x256xf32>
    %14 = arith.mulf %13, %12 : vector<1x256xf32>
    %15 = arith.addf %10, %14 : vector<1x256xf32>
    %c0_6 = arith.constant 0 : index
    %c2 = arith.constant 2 : index
    %16 = memref.load %arg2[%c0_6, %c2] : memref<2x4xf32, #tpu.memory_space<smem>>
    %17 = vector.extract_strided_slice %1 {offsets = [2, 0], sizes = [1, 256], strides = [1, 1]} : vector<4x256xf32> to vector<1x256xf32>
    %18 = vector.broadcast %16 : f32 to vector<1x256xf32>
    %19 = arith.mulf %18, %17 : vector<1x256xf32>
    %20 = arith.addf %15, %19 : vector<1x256xf32>
    %c0_7 = arith.constant 0 : index
    %c3 = arith.constant 3 : index
    %21 = memref.load %arg2[%c0_7, %c3] : memref<2x4xf32, #tpu.memory_space<smem>>
    %22 = vector.extract_strided_slice %1 {offsets = [3, 0], sizes = [1, 256], strides = [1, 1]} : vector<4x256xf32> to vector<1x256xf32>
    %23 = vector.broadcast %21 : f32 to vector<1x256xf32>
    %24 = arith.mulf %23, %22 : vector<1x256xf32>
    %25 = arith.addf %20, %24 : vector<1x256xf32>
    %cst_8 = arith.constant 0.000000e+00 : f32
    %26 = vector.broadcast %cst_8 : f32 to vector<1x256xf32>
    %27 = arith.subf %26, %25 : vector<1x256xf32>
    %28 = math.exp %27 : vector<1x256xf32>
    %cst_9 = arith.constant 1.000000e+00 : f32
    %29 = vector.broadcast %cst_9 : f32 to vector<1x256xf32>
    %30 = arith.addf %29, %28 : vector<1x256xf32>
    %cst_10 = arith.constant 1.000000e+00 : f32
    %31 = vector.broadcast %cst_10 : f32 to vector<1x256xf32>
    %32 = arith.divf %31, %30 : vector<1x256xf32>
    %33 = arith.mulf %25, %32 : vector<1x256xf32>
    %cst_11 = arith.constant 0.000000e+00 : f32
    %34 = vector.broadcast %cst_11 : f32 to vector<1x256xf32>
    %c1_12 = arith.constant 1 : index
    %35 = memref.load %arg3[%c1_12] : memref<2xf32, #tpu.memory_space<smem>>
    %36 = vector.broadcast %35 : f32 to vector<1x256xf32>
    %37 = arith.addf %34, %36 : vector<1x256xf32>
    %c1_13 = arith.constant 1 : index
    %c0_14 = arith.constant 0 : index
    %38 = memref.load %arg2[%c1_13, %c0_14] : memref<2x4xf32, #tpu.memory_space<smem>>
    %39 = vector.extract_strided_slice %1 {offsets = [0, 0], sizes = [1, 256], strides = [1, 1]} : vector<4x256xf32> to vector<1x256xf32>
    %40 = vector.broadcast %38 : f32 to vector<1x256xf32>
    %41 = arith.mulf %40, %39 : vector<1x256xf32>
    %42 = arith.addf %37, %41 : vector<1x256xf32>
    %c1_15 = arith.constant 1 : index
    %c1_16 = arith.constant 1 : index
    %43 = memref.load %arg2[%c1_15, %c1_16] : memref<2x4xf32, #tpu.memory_space<smem>>
    %44 = vector.extract_strided_slice %1 {offsets = [1, 0], sizes = [1, 256], strides = [1, 1]} : vector<4x256xf32> to vector<1x256xf32>
    %45 = vector.broadcast %43 : f32 to vector<1x256xf32>
    %46 = arith.mulf %45, %44 : vector<1x256xf32>
    %47 = arith.addf %42, %46 : vector<1x256xf32>
    %c1_17 = arith.constant 1 : index
    %c2_18 = arith.constant 2 : index
    %48 = memref.load %arg2[%c1_17, %c2_18] : memref<2x4xf32, #tpu.memory_space<smem>>
    %49 = vector.extract_strided_slice %1 {offsets = [2, 0], sizes = [1, 256], strides = [1, 1]} : vector<4x256xf32> to vector<1x256xf32>
    %50 = vector.broadcast %48 : f32 to vector<1x256xf32>
    %51 = arith.mulf %50, %49 : vector<1x256xf32>
    %52 = arith.addf %47, %51 : vector<1x256xf32>
    %c1_19 = arith.constant 1 : index
    %c3_20 = arith.constant 3 : index
    %53 = memref.load %arg2[%c1_19, %c3_20] : memref<2x4xf32, #tpu.memory_space<smem>>
    %54 = vector.extract_strided_slice %1 {offsets = [3, 0], sizes = [1, 256], strides = [1, 1]} : vector<4x256xf32> to vector<1x256xf32>
    %55 = vector.broadcast %53 : f32 to vector<1x256xf32>
    %56 = arith.mulf %55, %54 : vector<1x256xf32>
    %57 = arith.addf %52, %56 : vector<1x256xf32>
    %cst_21 = arith.constant 0.000000e+00 : f32
    %58 = vector.broadcast %cst_21 : f32 to vector<1x256xf32>
    %59 = arith.subf %58, %57 : vector<1x256xf32>
    %60 = math.exp %59 : vector<1x256xf32>
    %cst_22 = arith.constant 1.000000e+00 : f32
    %61 = vector.broadcast %cst_22 : f32 to vector<1x256xf32>
    %62 = arith.addf %61, %60 : vector<1x256xf32>
    %cst_23 = arith.constant 1.000000e+00 : f32
    %63 = vector.broadcast %cst_23 : f32 to vector<1x256xf32>
    %64 = arith.divf %63, %62 : vector<1x256xf32>
    %65 = arith.mulf %57, %64 : vector<1x256xf32>
    %c0_24 = arith.constant 0 : index
    %c0_25 = arith.constant 0 : index
    %66 = vector.load %arg6[%c0_24, %c0_25] : memref<9x256xf32, #tpu.memory_space<vmem>>, vector<1x256xf32>
    %c17_i32 = arith.constant 17 : i32
    %67 = tpu.dynamic_rotate %33 by %c17_i32 dim 1 : vector<1x256xf32>, i32 -> vector<1x256xf32>
    %68 = arith.mulf %67, %66 : vector<1x256xf32>
    %c17_i32_26 = arith.constant 17 : i32
    %69 = tpu.dynamic_rotate %65 by %c17_i32_26 dim 1 : vector<1x256xf32>, i32 -> vector<1x256xf32>
    %70 = arith.mulf %69, %66 : vector<1x256xf32>
    %c1_27 = arith.constant 1 : index
    %c0_28 = arith.constant 0 : index
    %71 = vector.load %arg6[%c1_27, %c0_28] : memref<9x256xf32, #tpu.memory_space<vmem>>, vector<1x256xf32>
    %c16_i32 = arith.constant 16 : i32
    %72 = tpu.dynamic_rotate %33 by %c16_i32 dim 1 : vector<1x256xf32>, i32 -> vector<1x256xf32>
    %73 = arith.mulf %72, %71 : vector<1x256xf32>
    %c16_i32_29 = arith.constant 16 : i32
    %74 = tpu.dynamic_rotate %65 by %c16_i32_29 dim 1 : vector<1x256xf32>, i32 -> vector<1x256xf32>
    %75 = arith.mulf %74, %71 : vector<1x256xf32>
    %c2_30 = arith.constant 2 : index
    %c0_31 = arith.constant 0 : index
    %76 = vector.load %arg6[%c2_30, %c0_31] : memref<9x256xf32, #tpu.memory_space<vmem>>, vector<1x256xf32>
    %c15_i32 = arith.constant 15 : i32
    %77 = tpu.dynamic_rotate %33 by %c15_i32 dim 1 : vector<1x256xf32>, i32 -> vector<1x256xf32>
    %78 = arith.mulf %77, %76 : vector<1x256xf32>
    %c15_i32_32 = arith.constant 15 : i32
    %79 = tpu.dynamic_rotate %65 by %c15_i32_32 dim 1 : vector<1x256xf32>, i32 -> vector<1x256xf32>
    %80 = arith.mulf %79, %76 : vector<1x256xf32>
    %c3_33 = arith.constant 3 : index
    %c0_34 = arith.constant 0 : index
    %81 = vector.load %arg6[%c3_33, %c0_34] : memref<9x256xf32, #tpu.memory_space<vmem>>, vector<1x256xf32>
    %c1_i32 = arith.constant 1 : i32
    %82 = tpu.dynamic_rotate %33 by %c1_i32 dim 1 : vector<1x256xf32>, i32 -> vector<1x256xf32>
    %83 = arith.mulf %82, %81 : vector<1x256xf32>
    %c1_i32_35 = arith.constant 1 : i32
    %84 = tpu.dynamic_rotate %65 by %c1_i32_35 dim 1 : vector<1x256xf32>, i32 -> vector<1x256xf32>
    %85 = arith.mulf %84, %81 : vector<1x256xf32>
    %c5 = arith.constant 5 : index
    %c0_36 = arith.constant 0 : index
    %86 = vector.load %arg6[%c5, %c0_36] : memref<9x256xf32, #tpu.memory_space<vmem>>, vector<1x256xf32>
    %c255_i32 = arith.constant 255 : i32
    %87 = tpu.dynamic_rotate %33 by %c255_i32 dim 1 : vector<1x256xf32>, i32 -> vector<1x256xf32>
    %88 = arith.mulf %87, %86 : vector<1x256xf32>
    %c255_i32_37 = arith.constant 255 : i32
    %89 = tpu.dynamic_rotate %65 by %c255_i32_37 dim 1 : vector<1x256xf32>, i32 -> vector<1x256xf32>
    %90 = arith.mulf %89, %86 : vector<1x256xf32>
    %c6 = arith.constant 6 : index
    %c0_38 = arith.constant 0 : index
    %91 = vector.load %arg6[%c6, %c0_38] : memref<9x256xf32, #tpu.memory_space<vmem>>, vector<1x256xf32>
    %c241_i32 = arith.constant 241 : i32
    %92 = tpu.dynamic_rotate %33 by %c241_i32 dim 1 : vector<1x256xf32>, i32 -> vector<1x256xf32>
    %93 = arith.mulf %92, %91 : vector<1x256xf32>
    %c241_i32_39 = arith.constant 241 : i32
    %94 = tpu.dynamic_rotate %65 by %c241_i32_39 dim 1 : vector<1x256xf32>, i32 -> vector<1x256xf32>
    %95 = arith.mulf %94, %91 : vector<1x256xf32>
    %c7 = arith.constant 7 : index
    %c0_40 = arith.constant 0 : index
    %96 = vector.load %arg6[%c7, %c0_40] : memref<9x256xf32, #tpu.memory_space<vmem>>, vector<1x256xf32>
    %c240_i32 = arith.constant 240 : i32
    %97 = tpu.dynamic_rotate %33 by %c240_i32 dim 1 : vector<1x256xf32>, i32 -> vector<1x256xf32>
    %98 = arith.mulf %97, %96 : vector<1x256xf32>
    %c240_i32_41 = arith.constant 240 : i32
    %99 = tpu.dynamic_rotate %65 by %c240_i32_41 dim 1 : vector<1x256xf32>, i32 -> vector<1x256xf32>
    %100 = arith.mulf %99, %96 : vector<1x256xf32>
    %c8 = arith.constant 8 : index
    %c0_42 = arith.constant 0 : index
    %101 = vector.load %arg6[%c8, %c0_42] : memref<9x256xf32, #tpu.memory_space<vmem>>, vector<1x256xf32>
    %c239_i32 = arith.constant 239 : i32
    %102 = tpu.dynamic_rotate %33 by %c239_i32 dim 1 : vector<1x256xf32>, i32 -> vector<1x256xf32>
    %103 = arith.mulf %102, %101 : vector<1x256xf32>
    %c239_i32_43 = arith.constant 239 : i32
    %104 = tpu.dynamic_rotate %65 by %c239_i32_43 dim 1 : vector<1x256xf32>, i32 -> vector<1x256xf32>
    %105 = arith.mulf %104, %101 : vector<1x256xf32>
    %cst_44 = arith.constant 0.000000e+00 : f32
    %106 = vector.broadcast %cst_44 : f32 to vector<1x256xf32>
    %c0_45 = arith.constant 0 : index
    %107 = memref.load %arg5[%c0_45] : memref<4xf32, #tpu.memory_space<smem>>
    %108 = vector.broadcast %107 : f32 to vector<1x256xf32>
    %109 = arith.addf %106, %108 : vector<1x256xf32>
    %c0_46 = arith.constant 0 : index
    %c0_47 = arith.constant 0 : index
    %110 = memref.load %arg4[%c0_46, %c0_47] : memref<4x18xf32, #tpu.memory_space<smem>>
    %111 = vector.broadcast %110 : f32 to vector<1x256xf32>
    %112 = arith.mulf %111, %68 : vector<1x256xf32>
    %113 = arith.addf %109, %112 : vector<1x256xf32>
    %c0_48 = arith.constant 0 : index
    %c1_49 = arith.constant 1 : index
    %114 = memref.load %arg4[%c0_48, %c1_49] : memref<4x18xf32, #tpu.memory_space<smem>>
    %115 = vector.broadcast %114 : f32 to vector<1x256xf32>
    %116 = arith.mulf %115, %73 : vector<1x256xf32>
    %117 = arith.addf %113, %116 : vector<1x256xf32>
    %c0_50 = arith.constant 0 : index
    %c2_51 = arith.constant 2 : index
    %118 = memref.load %arg4[%c0_50, %c2_51] : memref<4x18xf32, #tpu.memory_space<smem>>
    %119 = vector.broadcast %118 : f32 to vector<1x256xf32>
    %120 = arith.mulf %119, %78 : vector<1x256xf32>
    %121 = arith.addf %117, %120 : vector<1x256xf32>
    %c0_52 = arith.constant 0 : index
    %c3_53 = arith.constant 3 : index
    %122 = memref.load %arg4[%c0_52, %c3_53] : memref<4x18xf32, #tpu.memory_space<smem>>
    %123 = vector.broadcast %122 : f32 to vector<1x256xf32>
    %124 = arith.mulf %123, %83 : vector<1x256xf32>
    %125 = arith.addf %121, %124 : vector<1x256xf32>
    %c0_54 = arith.constant 0 : index
    %c4 = arith.constant 4 : index
    %126 = memref.load %arg4[%c0_54, %c4] : memref<4x18xf32, #tpu.memory_space<smem>>
    %127 = vector.broadcast %126 : f32 to vector<1x256xf32>
    %128 = arith.mulf %127, %33 : vector<1x256xf32>
    %129 = arith.addf %125, %128 : vector<1x256xf32>
    %c0_55 = arith.constant 0 : index
    %c5_56 = arith.constant 5 : index
    %130 = memref.load %arg4[%c0_55, %c5_56] : memref<4x18xf32, #tpu.memory_space<smem>>
    %131 = vector.broadcast %130 : f32 to vector<1x256xf32>
    %132 = arith.mulf %131, %88 : vector<1x256xf32>
    %133 = arith.addf %129, %132 : vector<1x256xf32>
    %c0_57 = arith.constant 0 : index
    %c6_58 = arith.constant 6 : index
    %134 = memref.load %arg4[%c0_57, %c6_58] : memref<4x18xf32, #tpu.memory_space<smem>>
    %135 = vector.broadcast %134 : f32 to vector<1x256xf32>
    %136 = arith.mulf %135, %93 : vector<1x256xf32>
    %137 = arith.addf %133, %136 : vector<1x256xf32>
    %c0_59 = arith.constant 0 : index
    %c7_60 = arith.constant 7 : index
    %138 = memref.load %arg4[%c0_59, %c7_60] : memref<4x18xf32, #tpu.memory_space<smem>>
    %139 = vector.broadcast %138 : f32 to vector<1x256xf32>
    %140 = arith.mulf %139, %98 : vector<1x256xf32>
    %141 = arith.addf %137, %140 : vector<1x256xf32>
    %c0_61 = arith.constant 0 : index
    %c8_62 = arith.constant 8 : index
    %142 = memref.load %arg4[%c0_61, %c8_62] : memref<4x18xf32, #tpu.memory_space<smem>>
    %143 = vector.broadcast %142 : f32 to vector<1x256xf32>
    %144 = arith.mulf %143, %103 : vector<1x256xf32>
    %145 = arith.addf %141, %144 : vector<1x256xf32>
    %c0_63 = arith.constant 0 : index
    %c9 = arith.constant 9 : index
    %146 = memref.load %arg4[%c0_63, %c9] : memref<4x18xf32, #tpu.memory_space<smem>>
    %147 = vector.broadcast %146 : f32 to vector<1x256xf32>
    %148 = arith.mulf %147, %70 : vector<1x256xf32>
    %149 = arith.addf %145, %148 : vector<1x256xf32>
    %c0_64 = arith.constant 0 : index
    %c10 = arith.constant 10 : index
    %150 = memref.load %arg4[%c0_64, %c10] : memref<4x18xf32, #tpu.memory_space<smem>>
    %151 = vector.broadcast %150 : f32 to vector<1x256xf32>
    %152 = arith.mulf %151, %75 : vector<1x256xf32>
    %153 = arith.addf %149, %152 : vector<1x256xf32>
    %c0_65 = arith.constant 0 : index
    %c11 = arith.constant 11 : index
    %154 = memref.load %arg4[%c0_65, %c11] : memref<4x18xf32, #tpu.memory_space<smem>>
    %155 = vector.broadcast %154 : f32 to vector<1x256xf32>
    %156 = arith.mulf %155, %80 : vector<1x256xf32>
    %157 = arith.addf %153, %156 : vector<1x256xf32>
    %c0_66 = arith.constant 0 : index
    %c12 = arith.constant 12 : index
    %158 = memref.load %arg4[%c0_66, %c12] : memref<4x18xf32, #tpu.memory_space<smem>>
    %159 = vector.broadcast %158 : f32 to vector<1x256xf32>
    %160 = arith.mulf %159, %85 : vector<1x256xf32>
    %161 = arith.addf %157, %160 : vector<1x256xf32>
    %c0_67 = arith.constant 0 : index
    %c13 = arith.constant 13 : index
    %162 = memref.load %arg4[%c0_67, %c13] : memref<4x18xf32, #tpu.memory_space<smem>>
    %163 = vector.broadcast %162 : f32 to vector<1x256xf32>
    %164 = arith.mulf %163, %65 : vector<1x256xf32>
    %165 = arith.addf %161, %164 : vector<1x256xf32>
    %c0_68 = arith.constant 0 : index
    %c14 = arith.constant 14 : index
    %166 = memref.load %arg4[%c0_68, %c14] : memref<4x18xf32, #tpu.memory_space<smem>>
    %167 = vector.broadcast %166 : f32 to vector<1x256xf32>
    %168 = arith.mulf %167, %90 : vector<1x256xf32>
    %169 = arith.addf %165, %168 : vector<1x256xf32>
    %c0_69 = arith.constant 0 : index
    %c15 = arith.constant 15 : index
    %170 = memref.load %arg4[%c0_69, %c15] : memref<4x18xf32, #tpu.memory_space<smem>>
    %171 = vector.broadcast %170 : f32 to vector<1x256xf32>
    %172 = arith.mulf %171, %95 : vector<1x256xf32>
    %173 = arith.addf %169, %172 : vector<1x256xf32>
    %c0_70 = arith.constant 0 : index
    %c16 = arith.constant 16 : index
    %174 = memref.load %arg4[%c0_70, %c16] : memref<4x18xf32, #tpu.memory_space<smem>>
    %175 = vector.broadcast %174 : f32 to vector<1x256xf32>
    %176 = arith.mulf %175, %100 : vector<1x256xf32>
    %177 = arith.addf %173, %176 : vector<1x256xf32>
    %c0_71 = arith.constant 0 : index
    %c17 = arith.constant 17 : index
    %178 = memref.load %arg4[%c0_71, %c17] : memref<4x18xf32, #tpu.memory_space<smem>>
    %179 = vector.broadcast %178 : f32 to vector<1x256xf32>
    %180 = arith.mulf %179, %105 : vector<1x256xf32>
    %181 = arith.addf %177, %180 : vector<1x256xf32>
    %cst_72 = arith.constant 0.000000e+00 : f32
    %182 = vector.broadcast %cst_72 : f32 to vector<1x256xf32>
    %183 = arith.subf %182, %181 : vector<1x256xf32>
    %184 = math.exp %183 : vector<1x256xf32>
    %cst_73 = arith.constant 1.000000e+00 : f32
    %185 = vector.broadcast %cst_73 : f32 to vector<1x256xf32>
    %186 = arith.addf %185, %184 : vector<1x256xf32>
    %cst_74 = arith.constant 1.000000e+00 : f32
    %187 = vector.broadcast %cst_74 : f32 to vector<1x256xf32>
    %188 = arith.divf %187, %186 : vector<1x256xf32>
    %189 = arith.mulf %181, %188 : vector<1x256xf32>
    %190 = vector.extract_strided_slice %1 {offsets = [0, 0], sizes = [1, 256], strides = [1, 1]} : vector<4x256xf32> to vector<1x256xf32>
    %191 = arith.addf %189, %190 : vector<1x256xf32>
    %c0_75 = arith.constant 0 : index
    %c0_76 = arith.constant 0 : index
    %c0_77 = arith.constant 0 : index
    %192 = vector.load %arg7[%c0_75, %c0_76, %c0_77] : memref<1x4x256xf32, #tpu.memory_space<vmem>>, vector<1x1x256xf32>
    %193 = vector.shape_cast %192 : vector<1x1x256xf32> to vector<1x256xf32>
    %194 = vector.shape_cast %191 : vector<1x256xf32> to vector<1x1x256xf32>
    tpu.vector_store %arg7[%c0_75, %c0_76, %c0_77], %194 {strides = array<i32>} : memref<1x4x256xf32, #tpu.memory_space<vmem>>, vector<1x1x256xf32>,
    %cst_78 = arith.constant 0.000000e+00 : f32
    %195 = vector.broadcast %cst_78 : f32 to vector<1x256xf32>
    %c1_79 = arith.constant 1 : index
    %196 = memref.load %arg5[%c1_79] : memref<4xf32, #tpu.memory_space<smem>>
    %197 = vector.broadcast %196 : f32 to vector<1x256xf32>
    %198 = arith.addf %195, %197 : vector<1x256xf32>
    %c1_80 = arith.constant 1 : index
    %c0_81 = arith.constant 0 : index
    %199 = memref.load %arg4[%c1_80, %c0_81] : memref<4x18xf32, #tpu.memory_space<smem>>
    %200 = vector.broadcast %199 : f32 to vector<1x256xf32>
    %201 = arith.mulf %200, %68 : vector<1x256xf32>
    %202 = arith.addf %198, %201 : vector<1x256xf32>
    %c1_82 = arith.constant 1 : index
    %c1_83 = arith.constant 1 : index
    %203 = memref.load %arg4[%c1_82, %c1_83] : memref<4x18xf32, #tpu.memory_space<smem>>
    %204 = vector.broadcast %203 : f32 to vector<1x256xf32>
    %205 = arith.mulf %204, %73 : vector<1x256xf32>
    %206 = arith.addf %202, %205 : vector<1x256xf32>
    %c1_84 = arith.constant 1 : index
    %c2_85 = arith.constant 2 : index
    %207 = memref.load %arg4[%c1_84, %c2_85] : memref<4x18xf32, #tpu.memory_space<smem>>
    %208 = vector.broadcast %207 : f32 to vector<1x256xf32>
    %209 = arith.mulf %208, %78 : vector<1x256xf32>
    %210 = arith.addf %206, %209 : vector<1x256xf32>
    %c1_86 = arith.constant 1 : index
    %c3_87 = arith.constant 3 : index
    %211 = memref.load %arg4[%c1_86, %c3_87] : memref<4x18xf32, #tpu.memory_space<smem>>
    %212 = vector.broadcast %211 : f32 to vector<1x256xf32>
    %213 = arith.mulf %212, %83 : vector<1x256xf32>
    %214 = arith.addf %210, %213 : vector<1x256xf32>
    %c1_88 = arith.constant 1 : index
    %c4_89 = arith.constant 4 : index
    %215 = memref.load %arg4[%c1_88, %c4_89] : memref<4x18xf32, #tpu.memory_space<smem>>
    %216 = vector.broadcast %215 : f32 to vector<1x256xf32>
    %217 = arith.mulf %216, %33 : vector<1x256xf32>
    %218 = arith.addf %214, %217 : vector<1x256xf32>
    %c1_90 = arith.constant 1 : index
    %c5_91 = arith.constant 5 : index
    %219 = memref.load %arg4[%c1_90, %c5_91] : memref<4x18xf32, #tpu.memory_space<smem>>
    %220 = vector.broadcast %219 : f32 to vector<1x256xf32>
    %221 = arith.mulf %220, %88 : vector<1x256xf32>
    %222 = arith.addf %218, %221 : vector<1x256xf32>
    %c1_92 = arith.constant 1 : index
    %c6_93 = arith.constant 6 : index
    %223 = memref.load %arg4[%c1_92, %c6_93] : memref<4x18xf32, #tpu.memory_space<smem>>
    %224 = vector.broadcast %223 : f32 to vector<1x256xf32>
    %225 = arith.mulf %224, %93 : vector<1x256xf32>
    %226 = arith.addf %222, %225 : vector<1x256xf32>
    %c1_94 = arith.constant 1 : index
    %c7_95 = arith.constant 7 : index
    %227 = memref.load %arg4[%c1_94, %c7_95] : memref<4x18xf32, #tpu.memory_space<smem>>
    %228 = vector.broadcast %227 : f32 to vector<1x256xf32>
    %229 = arith.mulf %228, %98 : vector<1x256xf32>
    %230 = arith.addf %226, %229 : vector<1x256xf32>
    %c1_96 = arith.constant 1 : index
    %c8_97 = arith.constant 8 : index
    %231 = memref.load %arg4[%c1_96, %c8_97] : memref<4x18xf32, #tpu.memory_space<smem>>
    %232 = vector.broadcast %231 : f32 to vector<1x256xf32>
    %233 = arith.mulf %232, %103 : vector<1x256xf32>
    %234 = arith.addf %230, %233 : vector<1x256xf32>
    %c1_98 = arith.constant 1 : index
    %c9_99 = arith.constant 9 : index
    %235 = memref.load %arg4[%c1_98, %c9_99] : memref<4x18xf32, #tpu.memory_space<smem>>
    %236 = vector.broadcast %235 : f32 to vector<1x256xf32>
    %237 = arith.mulf %236, %70 : vector<1x256xf32>
    %238 = arith.addf %234, %237 : vector<1x256xf32>
    %c1_100 = arith.constant 1 : index
    %c10_101 = arith.constant 10 : index
    %239 = memref.load %arg4[%c1_100, %c10_101] : memref<4x18xf32, #tpu.memory_space<smem>>
    %240 = vector.broadcast %239 : f32 to vector<1x256xf32>
    %241 = arith.mulf %240, %75 : vector<1x256xf32>
    %242 = arith.addf %238, %241 : vector<1x256xf32>
    %c1_102 = arith.constant 1 : index
    %c11_103 = arith.constant 11 : index
    %243 = memref.load %arg4[%c1_102, %c11_103] : memref<4x18xf32, #tpu.memory_space<smem>>
    %244 = vector.broadcast %243 : f32 to vector<1x256xf32>
    %245 = arith.mulf %244, %80 : vector<1x256xf32>
    %246 = arith.addf %242, %245 : vector<1x256xf32>
    %c1_104 = arith.constant 1 : index
    %c12_105 = arith.constant 12 : index
    %247 = memref.load %arg4[%c1_104, %c12_105] : memref<4x18xf32, #tpu.memory_space<smem>>
    %248 = vector.broadcast %247 : f32 to vector<1x256xf32>
    %249 = arith.mulf %248, %85 : vector<1x256xf32>
    %250 = arith.addf %246, %249 : vector<1x256xf32>
    %c1_106 = arith.constant 1 : index
    %c13_107 = arith.constant 13 : index
    %251 = memref.load %arg4[%c1_106, %c13_107] : memref<4x18xf32, #tpu.memory_space<smem>>
    %252 = vector.broadcast %251 : f32 to vector<1x256xf32>
    %253 = arith.mulf %252, %65 : vector<1x256xf32>
    %254 = arith.addf %250, %253 : vector<1x256xf32>
    %c1_108 = arith.constant 1 : index
    %c14_109 = arith.constant 14 : index
    %255 = memref.load %arg4[%c1_108, %c14_109] : memref<4x18xf32, #tpu.memory_space<smem>>
    %256 = vector.broadcast %255 : f32 to vector<1x256xf32>
    %257 = arith.mulf %256, %90 : vector<1x256xf32>
    %258 = arith.addf %254, %257 : vector<1x256xf32>
    %c1_110 = arith.constant 1 : index
    %c15_111 = arith.constant 15 : index
    %259 = memref.load %arg4[%c1_110, %c15_111] : memref<4x18xf32, #tpu.memory_space<smem>>
    %260 = vector.broadcast %259 : f32 to vector<1x256xf32>
    %261 = arith.mulf %260, %95 : vector<1x256xf32>
    %262 = arith.addf %258, %261 : vector<1x256xf32>
    %c1_112 = arith.constant 1 : index
    %c16_113 = arith.constant 16 : index
    %263 = memref.load %arg4[%c1_112, %c16_113] : memref<4x18xf32, #tpu.memory_space<smem>>
    %264 = vector.broadcast %263 : f32 to vector<1x256xf32>
    %265 = arith.mulf %264, %100 : vector<1x256xf32>
    %266 = arith.addf %262, %265 : vector<1x256xf32>
    %c1_114 = arith.constant 1 : index
    %c17_115 = arith.constant 17 : index
    %267 = memref.load %arg4[%c1_114, %c17_115] : memref<4x18xf32, #tpu.memory_space<smem>>
    %268 = vector.broadcast %267 : f32 to vector<1x256xf32>
    %269 = arith.mulf %268, %105 : vector<1x256xf32>
    %270 = arith.addf %266, %269 : vector<1x256xf32>
    %cst_116 = arith.constant 0.000000e+00 : f32
    %271 = vector.broadcast %cst_116 : f32 to vector<1x256xf32>
    %272 = arith.subf %271, %270 : vector<1x256xf32>
    %273 = math.exp %272 : vector<1x256xf32>
    %cst_117 = arith.constant 1.000000e+00 : f32
    %274 = vector.broadcast %cst_117 : f32 to vector<1x256xf32>
    %275 = arith.addf %274, %273 : vector<1x256xf32>
    %cst_118 = arith.constant 1.000000e+00 : f32
    %276 = vector.broadcast %cst_118 : f32 to vector<1x256xf32>
    %277 = arith.divf %276, %275 : vector<1x256xf32>
    %278 = arith.mulf %270, %277 : vector<1x256xf32>
    %279 = vector.extract_strided_slice %1 {offsets = [1, 0], sizes = [1, 256], strides = [1, 1]} : vector<4x256xf32> to vector<1x256xf32>
    %280 = arith.addf %278, %279 : vector<1x256xf32>
    %c0_119 = arith.constant 0 : index
    %c1_120 = arith.constant 1 : index
    %c0_121 = arith.constant 0 : index
    %281 = vector.load %arg7[%c0_119, %c1_120, %c0_121] : memref<1x4x256xf32, #tpu.memory_space<vmem>>, vector<1x1x256xf32>
    %282 = vector.shape_cast %281 : vector<1x1x256xf32> to vector<1x256xf32>
    %283 = vector.shape_cast %280 : vector<1x256xf32> to vector<1x1x256xf32>
    tpu.vector_store %arg7[%c0_119, %c1_120, %c0_121], %283 {strides = array<i32>} : memref<1x4x256xf32, #tpu.memory_space<vmem>>, vector<1x1x256xf32>,
    %cst_122 = arith.constant 0.000000e+00 : f32
    %284 = vector.broadcast %cst_122 : f32 to vector<1x256xf32>
    %c2_123 = arith.constant 2 : index
    %285 = memref.load %arg5[%c2_123] : memref<4xf32, #tpu.memory_space<smem>>
    %286 = vector.broadcast %285 : f32 to vector<1x256xf32>
    %287 = arith.addf %284, %286 : vector<1x256xf32>
    %c2_124 = arith.constant 2 : index
    %c0_125 = arith.constant 0 : index
    %288 = memref.load %arg4[%c2_124, %c0_125] : memref<4x18xf32, #tpu.memory_space<smem>>
    %289 = vector.broadcast %288 : f32 to vector<1x256xf32>
    %290 = arith.mulf %289, %68 : vector<1x256xf32>
    %291 = arith.addf %287, %290 : vector<1x256xf32>
    %c2_126 = arith.constant 2 : index
    %c1_127 = arith.constant 1 : index
    %292 = memref.load %arg4[%c2_126, %c1_127] : memref<4x18xf32, #tpu.memory_space<smem>>
    %293 = vector.broadcast %292 : f32 to vector<1x256xf32>
    %294 = arith.mulf %293, %73 : vector<1x256xf32>
    %295 = arith.addf %291, %294 : vector<1x256xf32>
    %c2_128 = arith.constant 2 : index
    %c2_129 = arith.constant 2 : index
    %296 = memref.load %arg4[%c2_128, %c2_129] : memref<4x18xf32, #tpu.memory_space<smem>>
    %297 = vector.broadcast %296 : f32 to vector<1x256xf32>
    %298 = arith.mulf %297, %78 : vector<1x256xf32>
    %299 = arith.addf %295, %298 : vector<1x256xf32>
    %c2_130 = arith.constant 2 : index
    %c3_131 = arith.constant 3 : index
    %300 = memref.load %arg4[%c2_130, %c3_131] : memref<4x18xf32, #tpu.memory_space<smem>>
    %301 = vector.broadcast %300 : f32 to vector<1x256xf32>
    %302 = arith.mulf %301, %83 : vector<1x256xf32>
    %303 = arith.addf %299, %302 : vector<1x256xf32>
    %c2_132 = arith.constant 2 : index
    %c4_133 = arith.constant 4 : index
    %304 = memref.load %arg4[%c2_132, %c4_133] : memref<4x18xf32, #tpu.memory_space<smem>>
    %305 = vector.broadcast %304 : f32 to vector<1x256xf32>
    %306 = arith.mulf %305, %33 : vector<1x256xf32>
    %307 = arith.addf %303, %306 : vector<1x256xf32>
    %c2_134 = arith.constant 2 : index
    %c5_135 = arith.constant 5 : index
    %308 = memref.load %arg4[%c2_134, %c5_135] : memref<4x18xf32, #tpu.memory_space<smem>>
    %309 = vector.broadcast %308 : f32 to vector<1x256xf32>
    %310 = arith.mulf %309, %88 : vector<1x256xf32>
    %311 = arith.addf %307, %310 : vector<1x256xf32>
    %c2_136 = arith.constant 2 : index
    %c6_137 = arith.constant 6 : index
    %312 = memref.load %arg4[%c2_136, %c6_137] : memref<4x18xf32, #tpu.memory_space<smem>>
    %313 = vector.broadcast %312 : f32 to vector<1x256xf32>
    %314 = arith.mulf %313, %93 : vector<1x256xf32>
    %315 = arith.addf %311, %314 : vector<1x256xf32>
    %c2_138 = arith.constant 2 : index
    %c7_139 = arith.constant 7 : index
    %316 = memref.load %arg4[%c2_138, %c7_139] : memref<4x18xf32, #tpu.memory_space<smem>>
    %317 = vector.broadcast %316 : f32 to vector<1x256xf32>
    %318 = arith.mulf %317, %98 : vector<1x256xf32>
    %319 = arith.addf %315, %318 : vector<1x256xf32>
    %c2_140 = arith.constant 2 : index
    %c8_141 = arith.constant 8 : index
    %320 = memref.load %arg4[%c2_140, %c8_141] : memref<4x18xf32, #tpu.memory_space<smem>>
    %321 = vector.broadcast %320 : f32 to vector<1x256xf32>
    %322 = arith.mulf %321, %103 : vector<1x256xf32>
    %323 = arith.addf %319, %322 : vector<1x256xf32>
    %c2_142 = arith.constant 2 : index
    %c9_143 = arith.constant 9 : index
    %324 = memref.load %arg4[%c2_142, %c9_143] : memref<4x18xf32, #tpu.memory_space<smem>>
    %325 = vector.broadcast %324 : f32 to vector<1x256xf32>
    %326 = arith.mulf %325, %70 : vector<1x256xf32>
    %327 = arith.addf %323, %326 : vector<1x256xf32>
    %c2_144 = arith.constant 2 : index
    %c10_145 = arith.constant 10 : index
    %328 = memref.load %arg4[%c2_144, %c10_145] : memref<4x18xf32, #tpu.memory_space<smem>>
    %329 = vector.broadcast %328 : f32 to vector<1x256xf32>
    %330 = arith.mulf %329, %75 : vector<1x256xf32>
    %331 = arith.addf %327, %330 : vector<1x256xf32>
    %c2_146 = arith.constant 2 : index
    %c11_147 = arith.constant 11 : index
    %332 = memref.load %arg4[%c2_146, %c11_147] : memref<4x18xf32, #tpu.memory_space<smem>>
    %333 = vector.broadcast %332 : f32 to vector<1x256xf32>
    %334 = arith.mulf %333, %80 : vector<1x256xf32>
    %335 = arith.addf %331, %334 : vector<1x256xf32>
    %c2_148 = arith.constant 2 : index
    %c12_149 = arith.constant 12 : index
    %336 = memref.load %arg4[%c2_148, %c12_149] : memref<4x18xf32, #tpu.memory_space<smem>>
    %337 = vector.broadcast %336 : f32 to vector<1x256xf32>
    %338 = arith.mulf %337, %85 : vector<1x256xf32>
    %339 = arith.addf %335, %338 : vector<1x256xf32>
    %c2_150 = arith.constant 2 : index
    %c13_151 = arith.constant 13 : index
    %340 = memref.load %arg4[%c2_150, %c13_151] : memref<4x18xf32, #tpu.memory_space<smem>>
    %341 = vector.broadcast %340 : f32 to vector<1x256xf32>
    %342 = arith.mulf %341, %65 : vector<1x256xf32>
    %343 = arith.addf %339, %342 : vector<1x256xf32>
    %c2_152 = arith.constant 2 : index
    %c14_153 = arith.constant 14 : index
    %344 = memref.load %arg4[%c2_152, %c14_153] : memref<4x18xf32, #tpu.memory_space<smem>>
    %345 = vector.broadcast %344 : f32 to vector<1x256xf32>
    %346 = arith.mulf %345, %90 : vector<1x256xf32>
    %347 = arith.addf %343, %346 : vector<1x256xf32>
    %c2_154 = arith.constant 2 : index
    %c15_155 = arith.constant 15 : index
    %348 = memref.load %arg4[%c2_154, %c15_155] : memref<4x18xf32, #tpu.memory_space<smem>>
    %349 = vector.broadcast %348 : f32 to vector<1x256xf32>
    %350 = arith.mulf %349, %95 : vector<1x256xf32>
    %351 = arith.addf %347, %350 : vector<1x256xf32>
    %c2_156 = arith.constant 2 : index
    %c16_157 = arith.constant 16 : index
    %352 = memref.load %arg4[%c2_156, %c16_157] : memref<4x18xf32, #tpu.memory_space<smem>>
    %353 = vector.broadcast %352 : f32 to vector<1x256xf32>
    %354 = arith.mulf %353, %100 : vector<1x256xf32>
    %355 = arith.addf %351, %354 : vector<1x256xf32>
    %c2_158 = arith.constant 2 : index
    %c17_159 = arith.constant 17 : index
    %356 = memref.load %arg4[%c2_158, %c17_159] : memref<4x18xf32, #tpu.memory_space<smem>>
    %357 = vector.broadcast %356 : f32 to vector<1x256xf32>
    %358 = arith.mulf %357, %105 : vector<1x256xf32>
    %359 = arith.addf %355, %358 : vector<1x256xf32>
    %cst_160 = arith.constant 0.000000e+00 : f32
    %360 = vector.broadcast %cst_160 : f32 to vector<1x256xf32>
    %361 = arith.subf %360, %359 : vector<1x256xf32>
    %362 = math.exp %361 : vector<1x256xf32>
    %cst_161 = arith.constant 1.000000e+00 : f32
    %363 = vector.broadcast %cst_161 : f32 to vector<1x256xf32>
    %364 = arith.addf %363, %362 : vector<1x256xf32>
    %cst_162 = arith.constant 1.000000e+00 : f32
    %365 = vector.broadcast %cst_162 : f32 to vector<1x256xf32>
    %366 = arith.divf %365, %364 : vector<1x256xf32>
    %367 = arith.mulf %359, %366 : vector<1x256xf32>
    %368 = vector.extract_strided_slice %1 {offsets = [2, 0], sizes = [1, 256], strides = [1, 1]} : vector<4x256xf32> to vector<1x256xf32>
    %369 = arith.addf %367, %368 : vector<1x256xf32>
    %c0_163 = arith.constant 0 : index
    %c2_164 = arith.constant 2 : index
    %c0_165 = arith.constant 0 : index
    %370 = vector.load %arg7[%c0_163, %c2_164, %c0_165] : memref<1x4x256xf32, #tpu.memory_space<vmem>>, vector<1x1x256xf32>
    %371 = vector.shape_cast %370 : vector<1x1x256xf32> to vector<1x256xf32>
    %372 = vector.shape_cast %369 : vector<1x256xf32> to vector<1x1x256xf32>
    tpu.vector_store %arg7[%c0_163, %c2_164, %c0_165], %372 {strides = array<i32>} : memref<1x4x256xf32, #tpu.memory_space<vmem>>, vector<1x1x256xf32>,
    %cst_166 = arith.constant 0.000000e+00 : f32
    %373 = vector.broadcast %cst_166 : f32 to vector<1x256xf32>
    %c3_167 = arith.constant 3 : index
    %374 = memref.load %arg5[%c3_167] : memref<4xf32, #tpu.memory_space<smem>>
    %375 = vector.broadcast %374 : f32 to vector<1x256xf32>
    %376 = arith.addf %373, %375 : vector<1x256xf32>
    %c3_168 = arith.constant 3 : index
    %c0_169 = arith.constant 0 : index
    %377 = memref.load %arg4[%c3_168, %c0_169] : memref<4x18xf32, #tpu.memory_space<smem>>
    %378 = vector.broadcast %377 : f32 to vector<1x256xf32>
    %379 = arith.mulf %378, %68 : vector<1x256xf32>
    %380 = arith.addf %376, %379 : vector<1x256xf32>
    %c3_170 = arith.constant 3 : index
    %c1_171 = arith.constant 1 : index
    %381 = memref.load %arg4[%c3_170, %c1_171] : memref<4x18xf32, #tpu.memory_space<smem>>
    %382 = vector.broadcast %381 : f32 to vector<1x256xf32>
    %383 = arith.mulf %382, %73 : vector<1x256xf32>
    %384 = arith.addf %380, %383 : vector<1x256xf32>
    %c3_172 = arith.constant 3 : index
    %c2_173 = arith.constant 2 : index
    %385 = memref.load %arg4[%c3_172, %c2_173] : memref<4x18xf32, #tpu.memory_space<smem>>
    %386 = vector.broadcast %385 : f32 to vector<1x256xf32>
    %387 = arith.mulf %386, %78 : vector<1x256xf32>
    %388 = arith.addf %384, %387 : vector<1x256xf32>
    %c3_174 = arith.constant 3 : index
    %c3_175 = arith.constant 3 : index
    %389 = memref.load %arg4[%c3_174, %c3_175] : memref<4x18xf32, #tpu.memory_space<smem>>
    %390 = vector.broadcast %389 : f32 to vector<1x256xf32>
    %391 = arith.mulf %390, %83 : vector<1x256xf32>
    %392 = arith.addf %388, %391 : vector<1x256xf32>
    %c3_176 = arith.constant 3 : index
    %c4_177 = arith.constant 4 : index
    %393 = memref.load %arg4[%c3_176, %c4_177] : memref<4x18xf32, #tpu.memory_space<smem>>
    %394 = vector.broadcast %393 : f32 to vector<1x256xf32>
    %395 = arith.mulf %394, %33 : vector<1x256xf32>
    %396 = arith.addf %392, %395 : vector<1x256xf32>
    %c3_178 = arith.constant 3 : index
    %c5_179 = arith.constant 5 : index
    %397 = memref.load %arg4[%c3_178, %c5_179] : memref<4x18xf32, #tpu.memory_space<smem>>
    %398 = vector.broadcast %397 : f32 to vector<1x256xf32>
    %399 = arith.mulf %398, %88 : vector<1x256xf32>
    %400 = arith.addf %396, %399 : vector<1x256xf32>
    %c3_180 = arith.constant 3 : index
    %c6_181 = arith.constant 6 : index
    %401 = memref.load %arg4[%c3_180, %c6_181] : memref<4x18xf32, #tpu.memory_space<smem>>
    %402 = vector.broadcast %401 : f32 to vector<1x256xf32>
    %403 = arith.mulf %402, %93 : vector<1x256xf32>
    %404 = arith.addf %400, %403 : vector<1x256xf32>
    %c3_182 = arith.constant 3 : index
    %c7_183 = arith.constant 7 : index
    %405 = memref.load %arg4[%c3_182, %c7_183] : memref<4x18xf32, #tpu.memory_space<smem>>
    %406 = vector.broadcast %405 : f32 to vector<1x256xf32>
    %407 = arith.mulf %406, %98 : vector<1x256xf32>
    %408 = arith.addf %404, %407 : vector<1x256xf32>
    %c3_184 = arith.constant 3 : index
    %c8_185 = arith.constant 8 : index
    %409 = memref.load %arg4[%c3_184, %c8_185] : memref<4x18xf32, #tpu.memory_space<smem>>
    %410 = vector.broadcast %409 : f32 to vector<1x256xf32>
    %411 = arith.mulf %410, %103 : vector<1x256xf32>
    %412 = arith.addf %408, %411 : vector<1x256xf32>
    %c3_186 = arith.constant 3 : index
    %c9_187 = arith.constant 9 : index
    %413 = memref.load %arg4[%c3_186, %c9_187] : memref<4x18xf32, #tpu.memory_space<smem>>
    %414 = vector.broadcast %413 : f32 to vector<1x256xf32>
    %415 = arith.mulf %414, %70 : vector<1x256xf32>
    %416 = arith.addf %412, %415 : vector<1x256xf32>
    %c3_188 = arith.constant 3 : index
    %c10_189 = arith.constant 10 : index
    %417 = memref.load %arg4[%c3_188, %c10_189] : memref<4x18xf32, #tpu.memory_space<smem>>
    %418 = vector.broadcast %417 : f32 to vector<1x256xf32>
    %419 = arith.mulf %418, %75 : vector<1x256xf32>
    %420 = arith.addf %416, %419 : vector<1x256xf32>
    %c3_190 = arith.constant 3 : index
    %c11_191 = arith.constant 11 : index
    %421 = memref.load %arg4[%c3_190, %c11_191] : memref<4x18xf32, #tpu.memory_space<smem>>
    %422 = vector.broadcast %421 : f32 to vector<1x256xf32>
    %423 = arith.mulf %422, %80 : vector<1x256xf32>
    %424 = arith.addf %420, %423 : vector<1x256xf32>
    %c3_192 = arith.constant 3 : index
    %c12_193 = arith.constant 12 : index
    %425 = memref.load %arg4[%c3_192, %c12_193] : memref<4x18xf32, #tpu.memory_space<smem>>
    %426 = vector.broadcast %425 : f32 to vector<1x256xf32>
    %427 = arith.mulf %426, %85 : vector<1x256xf32>
    %428 = arith.addf %424, %427 : vector<1x256xf32>
    %c3_194 = arith.constant 3 : index
    %c13_195 = arith.constant 13 : index
    %429 = memref.load %arg4[%c3_194, %c13_195] : memref<4x18xf32, #tpu.memory_space<smem>>
    %430 = vector.broadcast %429 : f32 to vector<1x256xf32>
    %431 = arith.mulf %430, %65 : vector<1x256xf32>
    %432 = arith.addf %428, %431 : vector<1x256xf32>
    %c3_196 = arith.constant 3 : index
    %c14_197 = arith.constant 14 : index
    %433 = memref.load %arg4[%c3_196, %c14_197] : memref<4x18xf32, #tpu.memory_space<smem>>
    %434 = vector.broadcast %433 : f32 to vector<1x256xf32>
    %435 = arith.mulf %434, %90 : vector<1x256xf32>
    %436 = arith.addf %432, %435 : vector<1x256xf32>
    %c3_198 = arith.constant 3 : index
    %c15_199 = arith.constant 15 : index
    %437 = memref.load %arg4[%c3_198, %c15_199] : memref<4x18xf32, #tpu.memory_space<smem>>
    %438 = vector.broadcast %437 : f32 to vector<1x256xf32>
    %439 = arith.mulf %438, %95 : vector<1x256xf32>
    %440 = arith.addf %436, %439 : vector<1x256xf32>
    %c3_200 = arith.constant 3 : index
    %c16_201 = arith.constant 16 : index
    %441 = memref.load %arg4[%c3_200, %c16_201] : memref<4x18xf32, #tpu.memory_space<smem>>
    %442 = vector.broadcast %441 : f32 to vector<1x256xf32>
    %443 = arith.mulf %442, %100 : vector<1x256xf32>
    %444 = arith.addf %440, %443 : vector<1x256xf32>
    %c3_202 = arith.constant 3 : index
    %c17_203 = arith.constant 17 : index
    %445 = memref.load %arg4[%c3_202, %c17_203] : memref<4x18xf32, #tpu.memory_space<smem>>
    %446 = vector.broadcast %445 : f32 to vector<1x256xf32>
    %447 = arith.mulf %446, %105 : vector<1x256xf32>
    %448 = arith.addf %444, %447 : vector<1x256xf32>
    %cst_204 = arith.constant 0.000000e+00 : f32
    %449 = vector.broadcast %cst_204 : f32 to vector<1x256xf32>
    %450 = arith.subf %449, %448 : vector<1x256xf32>
    %451 = math.exp %450 : vector<1x256xf32>
    %cst_205 = arith.constant 1.000000e+00 : f32
    %452 = vector.broadcast %cst_205 : f32 to vector<1x256xf32>
    %453 = arith.addf %452, %451 : vector<1x256xf32>
    %cst_206 = arith.constant 1.000000e+00 : f32
    %454 = vector.broadcast %cst_206 : f32 to vector<1x256xf32>
    %455 = arith.divf %454, %453 : vector<1x256xf32>
    %456 = arith.mulf %448, %455 : vector<1x256xf32>
    %457 = vector.extract_strided_slice %1 {offsets = [3, 0], sizes = [1, 256], strides = [1, 1]} : vector<4x256xf32> to vector<1x256xf32>
    %458 = arith.addf %456, %457 : vector<1x256xf32>
    %c0_207 = arith.constant 0 : index
    %c3_208 = arith.constant 3 : index
    %c0_209 = arith.constant 0 : index
    %459 = vector.load %arg7[%c0_207, %c3_208, %c0_209] : memref<1x4x256xf32, #tpu.memory_space<vmem>>, vector<1x1x256xf32>
    %460 = vector.shape_cast %459 : vector<1x1x256xf32> to vector<1x256xf32>
    %461 = vector.shape_cast %458 : vector<1x256xf32> to vector<1x1x256xf32>
    tpu.vector_store %arg7[%c0_207, %c3_208, %c0_209], %461 {strides = array<i32>} : memref<1x4x256xf32, #tpu.memory_space<vmem>>, vector<1x1x256xf32>,
    return
  }
  func.func @transform_0(%arg0: i32) -> (i32, i32, i32) {
    %c0_i32 = arith.constant 0 : i32
    %c0_i32_0 = arith.constant 0 : i32
    %c0_i32_1 = arith.constant 0 : i32
    return %arg0, %c0_i32, %c0_i32_0 : i32, i32, i32
  }
  func.func @transform_1(%arg0: i32) -> (i32, i32) {
    %c0_i32 = arith.constant 0 : i32
    %c0_i32_0 = arith.constant 0 : i32
    %c0_i32_1 = arith.constant 0 : i32
    return %c0_i32, %c0_i32_0 : i32, i32
  }
  func.func @transform_2(%arg0: i32) -> i32 {
    %c0_i32 = arith.constant 0 : i32
    %c0_i32_0 = arith.constant 0 : i32
    return %c0_i32 : i32
  }
  func.func @transform_3(%arg0: i32) -> (i32, i32) {
    %c0_i32 = arith.constant 0 : i32
    %c0_i32_0 = arith.constant 0 : i32
    %c0_i32_1 = arith.constant 0 : i32
    return %c0_i32, %c0_i32_0 : i32, i32
  }
  func.func @transform_4(%arg0: i32) -> i32 {
    %c0_i32 = arith.constant 0 : i32
    %c0_i32_0 = arith.constant 0 : i32
    return %c0_i32 : i32
  }
  func.func @transform_5(%arg0: i32) -> (i32, i32) {
    %c0_i32 = arith.constant 0 : i32
    %c0_i32_0 = arith.constant 0 : i32
    %c0_i32_1 = arith.constant 0 : i32
    return %c0_i32, %c0_i32_0 : i32, i32
  }
  func.func @transform_6(%arg0: i32) -> (i32, i32, i32) {
    %c0_i32 = arith.constant 0 : i32
    %c0_i32_0 = arith.constant 0 : i32
    %c0_i32_1 = arith.constant 0 : i32
    return %arg0, %c0_i32, %c0_i32_0 : i32, i32, i32
  }
}

</mosaic_0001>

<bundles_post_ra>
// kernel: tpu_custom_call.1
= control target key start
LH: loop header
LB: loop body
LE: loop exit
PB: predicated region body
PF: predicated region fallthrough
CT: control target
= control target key end

     0   :  { %s3146_s0 = inlined_call_operand.hbm [shape: f32[2,4,256], index: 0, kind: input, shape index: {}]   ;;  %s3147_s1 = inlined_call_operand.vmem [shape: f32[2,4], index: 1, kind: input, shape index: {}]   ;;  %s3148_s2 = inlined_call_operand.vmem [shape: f32[2], index: 2, kind: input, shape index: {}]   ;;  %s3149_s3 = inlined_call_operand.vmem [shape: f32[4,18], index: 3, kind: input, shape index: {}]   ;;  %s3150_s4 = inlined_call_operand.vmem [shape: f32[4], index: 4, kind: input, shape index: {}]   ;;  %s3151_s5 = inlined_call_operand.hbm [shape: f32[9,256], index: 5, kind: input, shape index: {}]   ;;  %s3152_s6 = inlined_call_operand.hbm [shape: f32[2,4,256], index: 6, kind: output, shape index: {}]  }
   0x1   :  { %3270 = sst [smem:[#allocation84_spill]] %s3146_s0 }
   0x2   :  { %3271 = sst [smem:[#allocation85_spill]] %s3147_s1 }
   0x3   :  { %3272 = sst [smem:[#allocation86_spill]] %s3148_s2 }
   0x4   :  { %3273 = sst [smem:[#allocation87_spill]] %s3149_s3 }
   0x5   :  { %3274 = sst [smem:[#allocation88_spill]] %s3150_s4 }
   0x6   :  { %3275 = sst [smem:[#allocation89_spill]] %s3151_s5 }
   0x7   :  { %3276 = sst [smem:[#allocation90_spill]] %s3152_s6 }
   0x8   :  { %11 = vsyncpa [#allocation3], 0 }
   0x9   :  { %13 = vsyncpa [#allocation3 + $0x1], 0 }
   0xa   :  { %14 = vsyncpa [#allocation5], 0 }
   0xb   :  { %15 = vsyncpa [#allocation8], 0 }
   0xc   :  { %16 = vsyncpa [#allocation11], 0 }
   0xd   :  { %17 = vsyncpa [#allocation13], 0 }
   0xe   :  { %18 = vsyncpa [#allocation4], 0 }
   0xf   :  { %20 = vsyncpa [#allocation4 + $0x1], 0  ;;  %s2044_s21 = smov 0   ;;  %s2046_s22 = smov 0  }
  0x10   :  { %s2048_s23 = smov 0   ;;  %s2050_s24 = smov 0  }
  0x11 LB: > { %3277 = sst [smem:[#allocation21_spill]] %s1977_s21  ;;  %s3281_s2 = sld [smem:[#allocation86_spill]]  ;;  %s1989_s24 = sphi %s2050_s24, %s3558_s24   ;;  %s1985_s23 = sphi %s2048_s23, %s3561_s23   ;;  %s1981_s22 = sphi %s2046_s22, %s3560_s22   ;;  %s1977_s21 = sphi %s2044_s21, %s3559_s21  }
  0x12   : > { %3278 = sst [smem:[#allocation22_spill]] %s1981_s22  ;;  %s2068_s28 = sadd.s32 4294967295, %s1989_s24  }
  0x13   : > { %3279 = sst [smem:[#allocation23_spill]] %s1985_s23  ;;  %p1524_p0 = scmp.ge.s32.totalorder %s1989_s24, 1 }
  0x14   : > { %3280 = sst [smem:[#allocation24_spill]] %s1989_s24  ;;  %p3153_p1 = scmp.eq.s32.totalorder %s2068_s28, 0 }
  0x15   : > { %3282 = sst [smem:[#allocation25_spill]] %s2068_s28  ;;  %p188_p2 = scmp.lt.s32.totalorder %s1989_s24, 3 }
  0x16   : > { %s3284_s1 = sld [smem:[#allocation85_spill]]  ;;  %s3285_s3 = sld [smem:[#allocation87_spill]] }
  0x17   : > { %s212_s27 = sshll.u32 %s3281_s2, 4  ;;  %p2073_p3 = pnand %p1524_p0, %p188_p2  ;;  %s213_s27 = int_to_ptr.vmem [resolvable:$true] %s212_s27 }
  0x18   : > { %s3287_s4 = sld [smem:[#allocation88_spill]]  ;;  %s1789_s16 = scalar_lea.vmem %s213_s27, 16 }
  0x19   : > { %s3283_s29 = scalar_select %p2073_p3, 1, 0 }
  0x1a   : > { %p1664_p5 = pneg %p2073_p3  ;;  %p1790_p7 = scmp.ne.s32.totalorder %s213_s27, %s1789_s16 }
  0x1b   : > { %p1797_p11 = scmp.lt.s32.totalorder %s213_s27, %s213_s27  ;;  %p1798_p12 = scmp.lt.s32.totalorder %s1789_s16, %s1789_s16 }
  0x1c   : > { %s201_s8 = sshll.u32 %s3284_s1, 4  ;;  %s223_s11 = sshll.u32 %s3285_s3, 4  ;;  %s202_s8 = int_to_ptr.vmem [resolvable:$true] %s201_s8  ;;  %s2092_s11 = int_to_ptr.vmem [resolvable:$true] %s223_s11 }
  0x1d   : > { %p2088_p6 = pnand %p1664_p5, %p3153_p1  ;;  %p1799_p13 = por %p1798_p12, %p1797_p11 }
  0x1e   : > { %s234_s15 = sshll.u32 %s3287_s4, 4  ;;  %s2097_s15 = int_to_ptr.vmem [resolvable:$true] %s234_s15 }
  0x1f   : > { %p2101_p8 = pneg %p2088_p6 }
  0x21   : > { %p1792_p9 = pnand %p2101_p8, %p1790_p7 }
  0x23   : > { %p1793_p10 = pneg %p1792_p9 }
  0x25   : > { %p1800_p0 = pnand %p1799_p13, %p1793_p10 }
  0x27   : > { %1803 = shalt.err (!%p1800_p0)
}
  0x28   : > { %s1991_s18 = smov [#allocation7]   ;;  %s1804_s19 = scalar_lea.vmem %s202_s8, 32 }
  0x29   : > { %1670 = dma.vmem_to_smem (!%p2088_p6), %s213_s27, 16, %s1991_s18, [#allocation8]  }
  0x2a   : > { %p1805_p2 = scmp.ne.s32.totalorder %s202_s8, %s1804_s19  ;;  %p1812_p1 = scmp.lt.s32.totalorder %s202_s8, %s202_s8 }
  0x2b   : > { %p1813_p3 = scmp.lt.s32.totalorder %s1804_s19, %s1804_s19 }
  0x2c   : > { %p1807_p5 = pnand %p1805_p2, %p2101_p8 }
  0x2d   : > { %p1814_p7 = por %p1813_p3, %p1812_p1 }
  0x2e   : > { %p1808_p4 = pneg %p1807_p5 }
  0x30   : > { %p1815_p9 = pnand %p1814_p7, %p1808_p4 }
  0x32   : > { %1818 = shalt.err (!%p1815_p9)
}
  0x33   : > { %s1992_s20 = smov [#allocation6]   ;;  %s1819_s25 = scalar_lea.vmem %s2092_s11, 64 }
  0x34   : > { %1667 = dma.vmem_to_smem (!%p2088_p6), %s202_s8, 32, %s1992_s20, [#allocation5]  }
  0x35   : > { %p1820_p10 = scmp.ne.s32.totalorder %s2092_s11, %s1819_s25  ;;  %p1827_p13 = scmp.lt.s32.totalorder %s2092_s11, %s2092_s11 }
  0x36   : > { %p1828_p0 = scmp.lt.s32.totalorder %s1819_s25, %s1819_s25 }
  0x37   : > { %p1822_p11 = pnand %p1820_p10, %p2101_p8 }
  0x38   : > { %p1829_p2 = por %p1828_p0, %p1827_p13 }
  0x39   : > { %p1823_p12 = pneg %p1822_p11 }
  0x3b   : > { %p1830_p1 = pnand %p1829_p2, %p1823_p12 }
  0x3d   : > { %1833 = shalt.err (!%p1830_p1)
}
  0x3e   : > { %s1993_s26 = smov [#allocation9]   ;;  %s1834_s27 = scalar_lea.vmem %s2097_s15, 16 }
  0x3f   : > { %1673 = dma.vmem_to_smem (!%p2088_p6), %s2092_s11, 64, %s1993_s26, [#allocation8]  }
  0x40   : > { %p1835_p3 = scmp.ne.s32.totalorder %s2097_s15, %s1834_s27  ;;  %p1842_p7 = scmp.lt.s32.totalorder %s2097_s15, %s2097_s15 }
  0x41   : > { %p1843_p9 = scmp.lt.s32.totalorder %s1834_s27, %s1834_s27 }
  0x42   : > { %p1837_p4 = pnand %p1835_p3, %p2101_p8 }
  0x43   : > { %p1844_p10 = por %p1843_p9, %p1842_p7 }
  0x44   : > { %p1838_p5 = pneg %p1837_p4 }
  0x46   : > { %p1845_p11 = pnand %p1844_p10, %p1838_p5 }
  0x48   : > { %1848 = shalt.err (!%p1845_p11)
}
  0x49   : > { %s1994_s30 = smov [#allocation10]   ;;  %s1995_s7 = smov [#allocation12]  }
  0x4a   : > { %1676 = dma.vmem_to_smem (!%p2088_p6), %s2097_s15, 16, %s1994_s30, [#allocation11]  }
  0x4b   : > { %s244_s8 = sshll.u32 %s1995_s7, 4  ;;  %s3289_s5 = sld [smem:[#allocation89_spill]]  ;;  %s245_s8 = int_to_ptr.vmem [resolvable:$true] %s244_s8 }
  0x51   : > { %s1849_s11 = scalar_lea.hbm %s3289_s5, 512 }
  0x52   : > { %p1850_p12 = scmp.ne.s32.totalorder %s3289_s5, %s1849_s11  ;;  %p1856_p2 = scmp.lt.u32.totalorder %s1849_s11, %s3289_s5 }
  0x54   : > { %p1852_p13 = pnand %p1850_p12, %p2101_p8 }
  0x56   : > { %p1853_p0 = pneg %p1852_p13 }
  0x58   : > { %p1858_p1 = pnand %p1856_p2, %p1853_p0 }
  0x5a   : > { %1861 = shalt.err (!%p1858_p1)
}
  0x5b   : > { %s1862_s15 = scalar_lea.vmem %s245_s8, 512  ;;  %p1870_p7 = scmp.lt.s32.totalorder %s245_s8, %s245_s8 }
  0x5c   : > { %p1863_p3 = scmp.ne.s32.totalorder %s245_s8, %s1862_s15  ;;  %p1871_p9 = scmp.lt.s32.totalorder %s1862_s15, %s1862_s15 }
  0x5e   : > { %p1865_p4 = pnand %p1863_p3, %p2101_p8  ;;  %p1872_p10 = por %p1871_p9, %p1870_p7 }
  0x60   : > { %p1866_p5 = pneg %p1865_p4 }
  0x62   : > { %p1873_p11 = pnand %p1872_p10, %p1866_p5 }
  0x64   : > { %1876 = shalt.err (!%p1873_p11)
}
  0x65   : > { %s1996_s19 = smov 256   ;;  %s1997_s17 = smov 16  }
  0x66   : > { %1679 = dma.hbm_to_vmem [thread:$0]  (!%p2088_p6), %s3289_s5, 512, %s245_s8, [#allocation13], %s1996_s19, %s1996_s19, %s1997_s17  }
  0x67   : > { %s1523_s26 = sadd.s32 4294967294, %s1989_s24   ;;  %s2151_s27 = sadd.s32 1, %s1989_s24  }
  0x68   : > { %3290 = sst [smem:[#allocation26_spill]] %s2151_s27  ;;  %s33_s30 = sadd.s32 1, %s1985_s23 }
  0x69   : > { %s30_s7 = ssub.s32 %s1989_s24, %s2151_s27  ;;  %p40_p8 = scmp.ne.s32.totalorder %s1985_s23, %s1981_s22 }
  0x6a   : > { %p31_p12 = scmp.eq.s32.totalorder %s30_s7, 0  ;;  %p41_p13 = scmp.eq.s32.totalorder %s1989_s24, 0 }
  0x6b   : > { %p46_p0 = scmp.ne.s32.totalorder %s1981_s22, %s1977_s21  ;;  %p175_p2 = scmp.eq.s32.totalorder %s2068_s28, 1 }
  0x6c   : > { %s2163_s9 = scalar_select %p31_p12, %s1985_s23, %s33_s30  }
  0x6d   : > { %p42_p1 = por %p41_p13, %p40_p8  ;;  %p3292_p3 = scmp.eq.s32.totalorder %s2068_s28, 0 }
  0x6e   : > { %3291 = sst [smem:[#allocation27_spill]] %s2163_s9  ;;  %p2171_p6 = por %p175_p2, %p40_p8 }
  0x6f   : > { %p2167_p4 = por %p3292_p3, %p46_p0  ;;  %p181_p5 = scmp.eq.s32.totalorder %s1523_s26, 1 }
  0x70   : > { %s3294_s8 = scalar_select %p2171_p6, 1, 0 }
  0x71   : > { %p1693_p7 = scmp.lt.s32.totalorder %s1989_s24, 2  ;;  %s258_s10 = sand.u32 1, %s1985_s23  }
  0x72   : > { %3295 = sst [smem:[#allocation28_spill]] %s3294_s8  ;;  %p2177_p9 = por %p181_p5, %p46_p0 }
  0x73   : > { %s1531_s13 = sshll.u32 %s258_s10, 3  ;;  %s1638_s14 = sshll.u32 %s1989_s24, 7 }
  0x74   : > { %s3296_s11 = scalar_select %p2177_p9, 1, 0 }
  0x75   : > { %s3298_s0 = sld [smem:[#allocation84_spill]]  ;;  %s262_s19 = scalar_lea.vmem [#allocation2], %s1531_s13 }
  0x76   : > { %3297 = sst [smem:[#allocation29_spill]] %s3296_s11  ;;  %s270_s17 = sshll.u32 %s262_s19, 4  ;;  %s2191_s17 = int_to_ptr.vmem [resolvable:$true] %s270_s17 }
  0x77   : > { %p2187_p10 = pnand %p1693_p7, %p42_p1  ;;  %s259_s25 = scalar_lea.sflag [#allocation3], %s258_s10 }
  0x79   : > { %p1879_p8 = pneg %p2187_p10 }
  0x7b   : > { %s2185_s15 = scalar_lea.hbm %s3298_s0, %s1638_s14  ;;  %s1882_s13 = scalar_lea.hbm %s3298_s0, 256 }
  0x7c   : > { %s1877_s26 = scalar_lea.hbm %s2185_s15, 128  ;;  %p1883_p0 = scmp.lt.u32.totalorder %s2185_s15, %s3298_s0 }
  0x7d   : > { %p1878_p11 = scmp.ne.s32.totalorder %s2185_s15, %s1877_s26  ;;  %p1884_p2 = scmp.lt.u32.totalorder %s1882_s13, %s1877_s26 }
  0x7e   : > { %p1886_p3 = scmp.lt.u32.totalorder %s1877_s26, %s2185_s15 }
  0x7f   : > { %p1880_p12 = pnand %p1879_p8, %p1878_p11  ;;  %p1885_p1 = por %p1884_p2, %p1883_p0 }
  0x81   : > { %p1881_p13 = pneg %p1880_p12  ;;  %p1887_p5 = por %p1886_p3, %p1885_p1 }
  0x83   : > { %p1888_p7 = pnand %p1887_p5, %p1881_p13 }
  0x85   : > { %1891 = shalt.err (!%p1888_p7)
}
  0x86   : > { %s1892_s10 = scalar_lea.vmem %s2191_s17, 128  ;;  %s1998_s18 = smov [#allocation2]  }
  0x87   : > { %p1893_p11 = scmp.ne.s32.totalorder %s2191_s17, %s1892_s10  ;;  %s1897_s19 = sshll.u32 %s1998_s18, 4  ;;  %s1898_s19 = int_to_ptr.vmem [resolvable:$false] %s1897_s19 }
  0x88   : > { %s1899_s30 = scalar_lea.vmem %s1898_s19, 256  ;;  %p1900_p6 = scmp.lt.s32.totalorder %s2191_s17, %s1898_s19 }
  0x89   : > { %p1895_p12 = pnand %p1893_p11, %p1879_p8  ;;  %p1901_p0 = scmp.lt.s32.totalorder %s1899_s30, %s1892_s10 }
  0x8b   : > { %p1896_p9 = pneg %p1895_p12  ;;  %p1902_p2 = por %p1901_p0, %p1900_p6 }
  0x8d   : > { %p1903_p1 = pnand %p1902_p2, %p1896_p9 }
  0x8f   : > { %1906 = shalt.err (!%p1903_p1)
}
  0x90   : > { %1683 = dma.hbm_to_vmem [thread:$0]  (!%p2187_p10), %s2185_s15, 128, %s2191_s17, %s259_s25  }
  0x91   : > { %p3300_p13 = scmp.ne.s32.totalorder %s3283_s29, 0 }
  0x93   : > { %279 = sbr.rel (%p3300_p13) target bundleno = 518 (0x206), region = 44 }
  0x9a   : > { %s2221_s26 = sand.u32 1, %s1981_s22  }
  0x9b   : > { %3301 = sst [smem:[#allocation30_spill]] %s2221_s26  ;;  %s3156_s7 = sshll.u32 %s2221_s26, 3 }
  0x9c   : > { %s282_s13 = scalar_lea.sflag [#allocation3], %s2221_s26  ;;  %s2227_s14 = scalar_lea.vmem [#allocation2], %s3156_s7 }
  0x9d   : > { %3302 = sst [smem:[#allocation31_spill]] %s2227_s14 }
  0x9e   : > { %1952 = dma.done.wait (%p2167_p4), %s282_s13, 128  }
  0x9f   : > { %1954 = vsyncadd (%p2167_p4), %s282_s13, 4294967168  ;;  %p3303_p6 = scmp.eq.s32.totalorder %s2068_s28, 0 }
  0xa1   : > { %1956 = dma.done.wait (%p3303_p6), [#allocation5], 32   ;;  %p3304_p9 = pmov %p3303_p6 }
  0xa2   : > { %p3305_p10 = pmov %p3303_p6 }
  0xa3   : > { %1958 = vsyncadd (%p3304_p9), [#allocation5], 4294967264 }
  0xa4   : > { %1960 = dma.done.wait (%p3305_p10), [#allocation8], 80   ;;  %p3306_p8 = pmov %p3303_p6 }
  0xa5   : > { %p3307_p3 = pmov %p3303_p6 }
  0xa6   : > { %1962 = vsyncadd (%p3306_p8), [#allocation8], 4294967216 }
  0xa7   : > { %1964 = dma.done.wait (%p3307_p3), [#allocation11], 16   ;;  %p3308_p5 = pmov %p3307_p3 }
  0xa8   : > { %p3309_p4 = pmov %p3307_p3 }
  0xa9   : > { %1966 = vsyncadd (%p3308_p5), [#allocation11], 4294967280 }
  0xaa   : > { %1968 = dma.done.wait (%p3309_p4), [#allocation13], 512   ;;  %p3310_p7 = pmov %p3307_p3 }
  0xac   : > { %1970 = vsyncadd (%p3310_p7), [#allocation13], 4294966784 }
  0xad   : > { %310 = sfence }
  0xae   : > { %s336_s29 = sld [smem:[#allocation7]]  ;;  %s1542_s15 = sld [smem:[#allocation6 + $0x1]]  ;;  %v335_v0 = vld [vmem:[%s2227_s14] sm:$0xff]  ;;  %v3219_v37 = vlaneseq  ;;  %v466_v53 = vld [vmem:[#allocation12 + $0x1] ss:$8 sm:$0x3] }
  0xaf   : > { %s339_s12 = sld [smem:[#allocation6]]  ;;  %s1544_s17 = sld [smem:[#allocation6 + $0x2]]  ;;  %v412_v54 = vld [vmem:[#allocation12] ss:$8 sm:$0x3] }
  0xb0   : > { %s1546_s20 = sld [smem:[#allocation6 + $0x3]]  ;;  %s1549_s25 = sld [smem:[#allocation6 + $0x80]]  ;;  %v2251_v39 = vshrl.u32 %v3219_v37, 7  ;;  %v496_v56 = vld [vmem:[#allocation12 + $0x2] ss:$8 sm:$0x3] }
  0xb1   : > { %s1550_s16 = sld [smem:[#allocation6 + $0x81]]  ;;  %s1552_s18 = sld [smem:[#allocation6 + $0x82]]  ;;  %v2339_v57 = vand.u32 127, %v3219_v37 }
  0xb2   : > { %s1548_s10 = sld [smem:[#allocation7 + $0x1]]  ;;  %s1554_s19 = sld [smem:[#allocation6 + $0x83]]  ;;  %3311 = vst [vmem:[#allocation32_spill] sm:$0xff] %v2251_v39  ;;  %v2254_v41 = vsub.s32 0, %v2251_v39  ;;  %v2259_v44 = vsub.s32 4, %v2251_v39  ;;  %v2324_v55 = vsub.s32 1, %v2251_v39 }
  0xb3   : > { %s1999_s30 = smov 16   ;;  %s2000_s13 = smov 17   ;;  %vm471_vm0 = vcmp.lt.s32.totalorder %v2339_v57, 16  ;;  %vm430_vm1 = vcmp.lt.s32.totalorder %v2339_v57, 17  ;;  %vm501_vm2 = vcmp.lt.s32.totalorder %v2339_v57, 15  ;;  %vm531_vm3 = vcmp.lt.s32.totalorder %v2339_v57, 1 }
  0xb4   : > { %v337_v1 = vstv %s336_s29  ;;  %v344_v4 = vstv %s1542_s15  ;;  %s2001_s29 = smov 15   ;;  %s2003_s15 = smov 127   ;;  %3331 = vst [vmem:[#allocation52_spill] sm:$0xff] %v2324_v55  ;;  %v2346_v58 = vrot.slane %v466_v53, %v2254_v41  ;;  %v2349_v59 = vrot.slane %v466_v53, %v2324_v55 }
  0xb5   : > { %v340_v2 = vstv %s339_s12  ;;  %v352_v5 = vstv %s1544_s17  ;;  %v345_v6 = vmul.f32 %v344_v4, %v335_v0  ;;  %s2002_s12 = smov 1   ;;  %s2004_s17 = smov 113   ;;  %v2352_v60 = vrot.slane %v412_v54, %v2254_v41 }
  0xb6   : > { %v341_v3 = vmul.f32 %v340_v2, %v335_v0  ;;  %v353_v7 = vmul.f32 %v352_v5, %v335_v0  ;;  %v360_v8 = vstv %s1546_s20  ;;  %v378_v15 = vstv %s1549_s25  ;;  %s2005_s20 = smov 112   ;;  %s2006_s25 = smov 111  }
  0xb7   : > { %v361_v10 = vmul.f32 %v360_v8, %v335_v0  ;;  %v1543_v11 = vrot.slane %v345_v6, 9  ;;  %v382_v16 = vstv %s1550_s16  ;;  %v379_v19 = vmul.f32 %v378_v15, %v335_v0  ;;  %s2279_s16 = sld [smem:[#allocation9 + $0x1]]  ;;  %s2303_s7 = sld [smem:[#allocation9 + $0x2]]  ;;  %v526_v6 = vld [vmem:[#allocation12 + $0x3] ss:$8 sm:$0x3] }
  0xb8   : > { %v342_v9 = vadd.f32 %v341_v3, %v337_v1  ;;  %v1545_v12 = vrot.slane %v353_v7, 10  ;;  %v383_v20 = vmul.f32 %v382_v16, %v335_v0  ;;  %v375_v21 = vstv %s1548_s10  ;;  %s2281_s10 = sld [smem:[#allocation9 + $0x81]]  ;;  %s2305_s0 = sld [smem:[#allocation9 + $0x82]] }
  0xb9   : > { %v1547_v14 = vrot.slane %v361_v10, 11  ;;  %v390_v22 = vstv %s1552_s18  ;;  %v380_v25 = vadd.f32 %v379_v19, %v375_v21  ;;  %v398_v28 = vstv %s1554_s19  ;;  %s2283_s18 = sld [smem:[#allocation9 + $0x101]]  ;;  %s2307_s1 = sld [smem:[#allocation9 + $0x102]] }
  0xba   : > { %v350_v13 = vadd.f32 %v1543_v11, %v342_v9  ;;  %v1551_v26 = vrot.slane %v383_v20, 9  ;;  %v391_v27 = vmul.f32 %v390_v22, %v335_v0  ;;  %v399_v31 = vmul.f32 %v398_v28, %v335_v0  ;;  %s2285_s19 = sld [smem:[#allocation9 + $0x181]]  ;;  %s2309_s2 = sld [smem:[#allocation9 + $0x182]]  ;;  %v586_v28 = vld [vmem:[#allocation12 + $0x6] ss:$8 sm:$0x3] }
  0xbb   : > { %s2311_s3 = sld [smem:[#allocation9 + $0x3]]  ;;  %s2319_s23 = sld [smem:[#allocation9 + $0x4]]  ;;  %v2355_v61 = vrot.slane %v412_v54, %v2324_v55  ;;  %v2379_v8 = vrot.slane %v496_v56, %v2254_v41  ;;  %v2396_v16 = vrot.slane %v496_v56, %v2324_v55  ;;  %v2480_v54 = vrot.slane %v586_v28, %v2254_v41 }
  0xbc   : > { %v358_v17 = vadd.f32 %v1545_v12, %v350_v13  ;;  %v388_v29 = vadd.f32 %v1551_v26, %v380_v25  ;;  %v1553_v30 = vrot.slane %v391_v27, 10  ;;  %v1555_v33 = vrot.slane %v399_v31, 11  ;;  %s2313_s4 = sld [smem:[#allocation9 + $0x83]]  ;;  %s2321_s22 = sld [smem:[#allocation9 + $0x84]] }
  0xbd   : > { %3312 = sst [smem:[#allocation33_spill]] %s2279_s16  ;;  %s2326_s27 = sld [smem:[#allocation9 + $0x5]]  ;;  %v685_v62 = vstv %s2279_s16  ;;  %v2421_v25 = vrot.slane %v526_v6, %v2324_v55  ;;  %v2483_v56 = vrot.slane %v586_v28, %v2324_v55  ;;  %vm561_vm4 = vcmp.lt.s32.totalorder %v2339_v57, 127 }
  0xbe   : > { %v366_v18 = vadd.f32 %v1547_v14, %v358_v17  ;;  %v396_v32 = vadd.f32 %v1553_v30, %v388_v29  ;;  %3323 = sst [smem:[#allocation44_spill]] %s2303_s7  ;;  %s2315_s5 = sld [smem:[#allocation9 + $0x103]]  ;;  %v866_v63 = vstv %s2281_s10  ;;  %v556_v14 = vld [vmem:[#allocation12 + $0x5] ss:$8 sm:$0x3]  ;;  %vm591_vm5 = vcmp.lt.s32.totalorder %v2339_v57, 113 }
  0xbf   : > { %3313 = sst [smem:[#allocation34_spill]] %s2283_s18  ;;  %s2317_s9 = sld [smem:[#allocation9 + $0x183]]  ;;  %v1043_v0 = vstv %s2283_s18  ;;  %3345 = vst [vmem:[#allocation66_spill] sm:$0xff] %v2421_v25  ;;  %vm621_vm6 = vcmp.lt.s32.totalorder %v2339_v57, 112  ;;  %vm651_vm7 = vcmp.lt.s32.totalorder %v2339_v57, 111 }
  0xc0   : > { %v367_v23 = vsub.f32 0.0, %v366_v18  ;;  %v404_v35 = vadd.f32 %v1555_v33, %v396_v32  ;;  %3314 = sst [smem:[#allocation35_spill]] %s2285_s19  ;;  %s2328_s24 = sld [smem:[#allocation9 + $0x104]]  ;;  %v1220_v1 = vstv %s2285_s19  ;;  %v2442_v33 = vrot.slane %v556_v14, %v2254_v41 }
  0xc1   : > { %3324 = sst [smem:[#allocation45_spill]] %s2305_s0  ;;  %s2330_s11 = sld [smem:[#allocation9 + $0x85]]  ;;  %v703_v9 = vstv %s2319_s23 }
  0xc2   : > { %v368_v24 = vmul.f32 1.442695, %v367_v23  ;;  %v405_v38 = vsub.f32 0.0, %v404_v35  ;;  %3325 = sst [smem:[#allocation46_spill]] %s2307_s1  ;;  %s2332_s21 = sld [smem:[#allocation9 + $0x184]]  ;;  %v884_v10 = vstv %s2321_s22 }
  0xc3   : > { %3326 = sst [smem:[#allocation47_spill]] %s2309_s2  ;;  %s2334_s6 = sld [smem:[#allocation9 + $0x105]] }
  0xc4   : > { %1748 = vpow2.f32 %v368_v24  ;;  %v406_v40 = vmul.f32 1.442695, %v405_v38  ;;  %3327 = sst [smem:[#allocation48_spill]] %s2311_s3  ;;  %s2336_s8 = sld [smem:[#allocation9 + $0x185]]  ;;  %v2418_v24 = vrot.slane %v526_v6, %v2254_v41 }
  0xc5   : > { %3328 = sst [smem:[#allocation49_spill]] %s2313_s4  ;;  %s2341_s28 = sld [smem:[#allocation9 + $0x6]]  ;;  %v616_v38 = vld [vmem:[#allocation12 + $0x7] ss:$8 sm:$0x3] }
  0xc6   : > { %3329 = sst [smem:[#allocation50_spill]] %s2315_s5  ;;  %s2343_s26 = sld [smem:[#allocation9 + $0x86]]  ;;  %v1061_v15 = vstv %s2328_s24 }
  0xc7   : > { %3330 = sst [smem:[#allocation51_spill]] %s2317_s9  ;;  %s2357_s14 = sld [smem:[#allocation9 + $0x106]] }
  0xc8   : > { %3332 = sst [smem:[#allocation53_spill]] %s2326_s27  ;;  %s2375_s16 = sld [smem:[#allocation9 + $0x187]]  ;;  %v1238_v19 = vstv %s2332_s21 }
  0xc9   : > { %3333 = sst [smem:[#allocation54_spill]] %s2330_s11  ;;  %s2383_s19 = sld [smem:[#allocation9 + $0x8]] }
  0xca   : > { %3334 = sst [smem:[#allocation55_spill]] %s2334_s6  ;;  %s2401_s22 = sld [smem:[#allocation9 + $0x9]] }
  0xcb   : > { %3335 = sst [smem:[#allocation56_spill]] %s2336_s8  ;;  %s2367_s8 = sld [smem:[#allocation9 + $0x87]] }
  0xcc   : > { %3336 = sst [smem:[#allocation57_spill]] %s2341_s28  ;;  %s2359_s28 = sld [smem:[#allocation9 + $0x186]] }
  0xcd   : > { %3337 = sst [smem:[#allocation58_spill]] %s2343_s26  ;;  %s2365_s26 = sld [smem:[#allocation9 + $0x7]] }
  0xce   : > { %v1749_v34 = vpop.eup %1748  ;;  %3338 = sst [smem:[#allocation59_spill]] %s2357_s14  ;;  %s2403_s23 = sld [smem:[#allocation9 + $0x89]] }
  0xcf   : > { %v370_v36 = vadd.f32 1.0, %v1749_v34  ;;  %3343 = sst [smem:[#allocation64_spill]] %s2375_s16  ;;  %s2427_s21 = sld [smem:[#allocation9 + $0xa]]  ;;  %v2445_v34 = vrot.slane %v556_v14, %v2324_v55 }
  0xd0   : > { %s2413_s24 = sld [smem:[#allocation9 + $0x109]]  ;;  %s2429_s2 = sld [smem:[#allocation9 + $0x8a]] }
  0xd1   : > { %1750 = vrcp.f32 %v370_v36  ;;  %3341 = sst [smem:[#allocation62_spill]] %s2367_s8  ;;  %s2415_s7 = sld [smem:[#allocation9 + $0x189]] }
  0xd2   : > { %1752 = vpow2.f32 %v406_v40  ;;  %3339 = sst [smem:[#allocation60_spill]] %s2359_s28  ;;  %s2373_s28 = sld [smem:[#allocation9 + $0x107]] }
  0xd3   : > { %3340 = sst [smem:[#allocation61_spill]] %s2365_s26  ;;  %s2437_s1 = sld [smem:[#allocation9 + $0x10a]] }
  0xd4   : > { %s2439_s0 = sld [smem:[#allocation9 + $0xd]]  ;;  %s2460_s27 = sld [smem:[#allocation9 + $0x18a]] }
  0xd5   : > { %s2449_s4 = sld [smem:[#allocation9 + $0x8d]]  ;;  %s2471_s6 = sld [smem:[#allocation9 + $0xb]] }
  0xd6   : > { %s2451_s9 = sld [smem:[#allocation9 + $0x10d]]  ;;  %s2485_s3 = sld [smem:[#allocation9 + $0x10b]] }
  0xd7   : > { %s2462_s11 = sld [smem:[#allocation9 + $0x18d]]  ;;  %s2495_s18 = sld [smem:[#allocation9 + $0x8c]] }
  0xd8   : > { %3342 = sst [smem:[#allocation63_spill]] %s2373_s28  ;;  %s2505_s5 = sld [smem:[#allocation9 + $0x10c]] }
  0xd9   : > { %s2517_s14 = sld [smem:[#allocation9 + $0xe]]  ;;  %s2535_s26 = sld [smem:[#allocation9 + $0xf]] }
  0xda   : > { %s2519_s8 = sld [smem:[#allocation9 + $0x8e]]  ;;  %v767_v37 = vstv %s2439_s0  ;;  %s2543_s0 = sld [smem:[#allocation9 + $0x10f]] }
  0xdb   : > { %v1751_v42 = vpop.eup %1750  ;;  %3350 = sst [smem:[#allocation67_spill]] %s2471_s6  ;;  %s2527_s16 = sld [smem:[#allocation9 + $0x10e]] }
  0xdc   : > { %v2256_v43 = vmul.f32 %v1751_v42, %v366_v18  ;;  %v1753_v47 = vpop.eup %1752  ;;  %3352 = sst [smem:[#allocation69_spill]] %s2485_s3  ;;  %s2529_s28 = sld [smem:[#allocation9 + $0x18e]] }
  0xdd   : > { %v408_v48 = vadd.f32 1.0, %v1753_v47  ;;  %v1302_v36 = vstv %s2462_s11  ;;  %s2571_s11 = sld [smem:[#allocation9 + $0x110]]  ;;  %s2581_s3 = sld [smem:[#allocation9 + $0x91]] }
  0xde   : > { %v417_v45 = vrot.slane %v2256_v43, %v2254_v41  ;;  %v421_v46 = vrot.slane %v2256_v43, %v2259_v44  ;;  %v2408_v22 = vmul.f32 %v703_v9, %v2256_v43  ;;  %v2411_v23 = vmul.f32 %v884_v10, %v2256_v43  ;;  %s2573_s6 = sld [smem:[#allocation9 + $0x190]]  ;;  %s3392_s10 = sld [smem:[#allocation50_spill]] }
  0xdf   : > { %1754 = vrcp.f32 %v408_v48  ;;  %v2425_v27 = vmul.f32 %v1061_v15, %v2256_v43  ;;  %v2435_v32 = vmul.f32 %v1238_v19, %v2256_v43  ;;  %v2498_v15 = vrot.slane %v616_v38, %v2254_v41  ;;  %3353 = sst [smem:[#allocation70_spill]] %s2517_s14  ;;  %s3389_s14 = sld [smem:[#allocation49_spill]] }
  0xe0   : > { %467 = vrot.lane.b32.xlu1 %v417_v45, %s1999_s30  ;;  %424 = vrot.lane.b32.xlu0 %v417_v45, %s2000_s13  ;;  %v2501_v19 = vrot.slane %v616_v38, %v2324_v55  ;;  %3354 = sst [smem:[#allocation71_spill]] %s2519_s8  ;;  %s3381_s8 = sld [smem:[#allocation47_spill]] }
  0xe1   : > { %3355 = sst [smem:[#allocation72_spill]] %s2527_s16 }
  0xe2   : > { %3356 = sst [smem:[#allocation73_spill]] %s2529_s28  ;;  %s3378_s28 = sld [smem:[#allocation44_spill]] }
  0xe3   : > { %3357 = sst [smem:[#allocation74_spill]] %s2535_s26  ;;  %s3412_s16 = sld [smem:[#allocation55_spill]] }
  0xe4   : > { %469 = vrot.lane.b32.xlu1 %v421_v46, %s1999_s30  ;;  %426 = vrot.lane.b32.xlu0 %v421_v46, %s2000_s13  ;;  %3359 = sst [smem:[#allocation76_spill]] %s2543_s0  ;;  %s3386_s26 = sld [smem:[#allocation48_spill]] }
  0xe5   : > { %3365 = sst [smem:[#allocation82_spill]] %s2573_s6  ;;  %s3379_s6 = sld [smem:[#allocation45_spill]] }
  0xe6   : > { %3366 = sst [smem:[#allocation83_spill]] %s2581_s3  ;;  %s3380_s3 = sld [smem:[#allocation46_spill]] }
  0xe7   : > { %s3410_s0 = sld [smem:[#allocation54_spill]] }
  0xe8   : > { %499 = vrot.lane.b32.xlu1 %v421_v46, %s2001_s29  ;;  %497 = vrot.lane.b32.xlu0 %v417_v45, %s2001_s29 }
  0xe9   : > { %v1755_v49 = vpop.eup %1754 }
  0xea   : > { %v2269_v50 = vmul.f32 %v1755_v49, %v404_v35 }
  0xec   : > { %529 = vrot.lane.b32.xlu1 %v421_v46, %s2002_s12  ;;  %527 = vrot.lane.b32.xlu0 %v417_v45, %s2002_s12  ;;  %v454_v51 = vrot.slane %v2269_v50, %v2259_v44  ;;  %v450_v52 = vrot.slane %v2269_v50, %v2254_v41  ;;  %v2551_v53 = vmul.f32 %v767_v37, %v2269_v50 }
  0xee   : > { %3361 = vst [vmem:[#allocation78_spill] sm:$0xff] %v2551_v53 }
  0xf0   : > { %559 = vrot.lane.b32.xlu1 %v421_v46, %s2003_s15  ;;  %557 = vrot.lane.b32.xlu0 %v417_v45, %s2003_s15 }
  0xf4   : > { %589 = vrot.lane.b32.xlu1 %v421_v46, %s2004_s17  ;;  %587 = vrot.lane.b32.xlu0 %v417_v45, %s2004_s17 }
  0xf8   : > { %619 = vrot.lane.b32.xlu1 %v421_v46, %s2005_s20  ;;  %617 = vrot.lane.b32.xlu0 %v417_v45, %s2005_s20 }
  0xfc   : > { %649 = vrot.lane.b32.xlu1 %v421_v46, %s2006_s25  ;;  %647 = vrot.lane.b32.xlu0 %v417_v45, %s2006_s25  ;;  %v646_v46 = vld [vmem:[#allocation12 + $0x10] ss:$8 sm:$0x3]  ;;  %v1125_v45 = vstv %s2451_s9  ;;  %s2563_s9 = sld [smem:[#allocation9 + $0x90]] }
  0xfd   : > { %v2512_v9 = vrot.slane %v646_v46, %v2254_v41  ;;  %v2515_v6 = vrot.slane %v646_v46, %v2324_v55  ;;  %v2559_v14 = vmul.f32 %v1125_v45, %v2269_v50 }
  0xff   : > { %3363 = vst [vmem:[#allocation80_spill] sm:$0xff] %v2559_v14  ;;  %v3398_v14 = vstv %s3392_s10  ;;  %s3435_s10 = sld [smem:[#allocation62_spill]] }
 0x100   : > { %459 = vrot.lane.b32.xlu1 %v454_v51, %s2000_s13  ;;  %457 = vrot.lane.b32.xlu0 %v450_v52, %s2000_s13  ;;  %s2289_s13 = sld [smem:[#allocation9 + $0x80]]  ;;  %v3399_v53 = vmov %v3398_v14 }
 0x104   : > { %489 = vrot.lane.b32.xlu1 %v454_v51, %s1999_s30  ;;  %487 = vrot.lane.b32.xlu0 %v450_v52, %s1999_s30  ;;  %s2287_s30 = sld [smem:[#allocation9]] }
 0x106   : > { %3316 = sst [smem:[#allocation37_spill]] %s2289_s13  ;;  %v860_v5 = vstv %s2289_s13  ;;  %s2487_s13 = sld [smem:[#allocation9 + $0x18b]] }
 0x108   : > { %519 = vrot.lane.b32.xlu1 %v454_v51, %s2001_s29  ;;  %517 = vrot.lane.b32.xlu0 %v450_v52, %s2001_s29  ;;  %s2291_s29 = sld [smem:[#allocation10]] }
 0x10a   : > { %3315 = sst [smem:[#allocation36_spill]] %s2287_s30  ;;  %v679_v3 = vstv %s2287_s30  ;;  %s2493_s30 = sld [smem:[#allocation9 + $0xc]] }
 0x10c   : > { %549 = vrot.lane.b32.xlu1 %v454_v51, %s2002_s12  ;;  %547 = vrot.lane.b32.xlu0 %v450_v52, %s2002_s12  ;;  %s2293_s12 = sld [smem:[#allocation10 + $0x1]] }
 0x10e   : > { %3317 = sst [smem:[#allocation38_spill]] %s2291_s29  ;;  %v676_v2 = vstv %s2291_s29 }
 0x10f   : > { %s2391_s29 = sld [smem:[#allocation9 + $0x108]] }
 0x110   : > { %579 = vrot.lane.b32.xlu1 %v454_v51, %s2003_s15  ;;  %577 = vrot.lane.b32.xlu0 %v450_v52, %s2003_s15  ;;  %s2295_s15 = sld [smem:[#allocation10 + $0x2]] }
 0x112   : > { %3318 = sst [smem:[#allocation39_spill]] %s2293_s12  ;;  %v857_v4 = vstv %s2293_s12  ;;  %s2385_s12 = sld [smem:[#allocation9 + $0x88]] }
 0x114   : > { %609 = vrot.lane.b32.xlu1 %v454_v51, %s2004_s17  ;;  %607 = vrot.lane.b32.xlu0 %v450_v52, %s2004_s17  ;;  %s2297_s17 = sld [smem:[#allocation9 + $0x100]] }
 0x115   : > { %3344 = sst [smem:[#allocation65_spill]] %s2391_s29  ;;  %s2545_s29 = sld [smem:[#allocation9 + $0x18f]] }
 0x116   : > { %3319 = sst [smem:[#allocation40_spill]] %s2295_s15  ;;  %v1034_v7 = vstv %s2295_s15  ;;  %s2393_s15 = sld [smem:[#allocation9 + $0x188]] }
 0x118   : > { %639 = vrot.lane.b32.xlu1 %v454_v51, %s2005_s20  ;;  %637 = vrot.lane.b32.xlu0 %v450_v52, %s2005_s20  ;;  %s2299_s20 = sld [smem:[#allocation10 + $0x3]] }
 0x11a   : > { %3320 = sst [smem:[#allocation41_spill]] %s2297_s17  ;;  %v1037_v11 = vstv %s2297_s17 }
 0x11b   : > { %s2473_s17 = sld [smem:[#allocation9 + $0x8b]]  ;;  %3360 = sst [smem:[#allocation77_spill]] %s2545_s29 }
 0x11c   : > { %669 = vrot.lane.b32.xlu1 %v454_v51, %s2006_s25  ;;  %667 = vrot.lane.b32.xlu0 %v450_v52, %s2006_s25  ;;  %s2301_s25 = sld [smem:[#allocation9 + $0x180]]  ;;  %v948_v51 = vstv %s2449_s4  ;;  %v2569_v52 = vmul.f32 %v1302_v36, %v2269_v50  ;;  %s3393_s29 = sld [smem:[#allocation51_spill]] }
 0x11d   : > { %v2556_v38 = vmul.f32 %v948_v51, %v2269_v50  ;;  %s2561_s4 = sld [smem:[#allocation9 + $0x10]] }
 0x11e   : > { %3321 = sst [smem:[#allocation42_spill]] %s2299_s20  ;;  %v1211_v12 = vstv %s2299_s20  ;;  %s2537_s20 = sld [smem:[#allocation9 + $0x8f]]  ;;  %3364 = vst [vmem:[#allocation81_spill] sm:$0xff] %v2569_v52 }
 0x11f   : > { %3362 = vst [vmem:[#allocation79_spill] sm:$0xff] %v2556_v38 }
 0x121   : > { %3351 = sst [smem:[#allocation68_spill]] %s2473_s17  ;;  %s2579_s17 = sld [smem:[#allocation9 + $0x11]] }
 0x122   : > { %3322 = sst [smem:[#allocation43_spill]] %s2301_s25  ;;  %v1214_v13 = vstv %s2301_s25  ;;  %s2507_s25 = sld [smem:[#allocation9 + $0x18c]] }
 0x124   : > { %3358 = sst [smem:[#allocation75_spill]] %s2537_s20  ;;  %s3407_s20 = sld [smem:[#allocation53_spill]] }
 0x152   : > { %v468_v51 = vpop.permute.xlu1 %467  ;;  %v425_v45 = vpop.permute.xlu0 %424 }
 0x156   : > { %v470_v36 = vpop.permute.xlu1 %469  ;;  %v427_v47 = vpop.permute.xlu0 %426 }
 0x157   : > { %v472_v50 = vsel %vm471_vm0, %v468_v51, %v470_v36  ;;  %v473_v35 = vsel %vm471_vm0, %v470_v36, %v468_v51  ;;  %v431_v10 = vsel %vm430_vm1, %v425_v45, %v427_v47  ;;  %v432_v49 = vsel %vm430_vm1, %v427_v47, %v425_v45 }
 0x158   : > { %v485_v28 = vmul.f32 %v2346_v58, %v473_v35  ;;  %v486_v43 = vmul.f32 %v2349_v59, %v472_v50  ;;  %v444_v51 = vmul.f32 %v2352_v60, %v432_v49  ;;  %v445_v36 = vmul.f32 %v2355_v61, %v431_v10 }
 0x15a   : > { %v686_v50 = vmul.f32 %v685_v62, %v485_v28  ;;  %v687_v49 = vmul.f32 %v685_v62, %v486_v43  ;;  %v500_v37 = vpop.permute.xlu1 %499  ;;  %v498_v10 = vpop.permute.xlu0 %497  ;;  %v867_v45 = vmul.f32 %v866_v63, %v485_v28  ;;  %v868_v48 = vmul.f32 %v866_v63, %v486_v43 }
 0x15b   : > { %v1044_v35 = vmul.f32 %v1043_v0, %v485_v28  ;;  %v1045_v42 = vmul.f32 %v1043_v0, %v486_v43  ;;  %v680_v62 = vmul.f32 %v679_v3, %v444_v51  ;;  %v681_v40 = vmul.f32 %v679_v3, %v445_v36 }
 0x15c   : > { %v861_v46 = vmul.f32 %v860_v5, %v444_v51  ;;  %v862_v47 = vmul.f32 %v860_v5, %v445_v36  ;;  %v1038_v63 = vmul.f32 %v1037_v11, %v444_v51  ;;  %v1039_v31 = vmul.f32 %v1037_v11, %v445_v36 }
 0x15d   : > { %v1215_v30 = vmul.f32 %v1214_v13, %v444_v51  ;;  %v1216_v0 = vmul.f32 %v1214_v13, %v445_v36  ;;  %v682_v29 = vadd.f32 %v680_v62, %v676_v2  ;;  %v683_v26 = vadd.f32 %v681_v40, %v676_v2 }
 0x15e   : > { %v863_v3 = vadd.f32 %v861_v46, %v857_v4  ;;  %v864_v21 = vadd.f32 %v862_v47, %v857_v4  ;;  %v530_v20 = vpop.permute.xlu1 %529  ;;  %v528_v18 = vpop.permute.xlu0 %527  ;;  %v1040_v5 = vadd.f32 %v1038_v63, %v1034_v7  ;;  %v1041_v17 = vadd.f32 %v1039_v31, %v1034_v7 }
 0x15f   : > { %v1217_v11 = vadd.f32 %v1215_v30, %v1211_v12  ;;  %v1218_v51 = vadd.f32 %v1216_v0, %v1211_v12  ;;  %v1221_v13 = vmul.f32 %v1220_v1, %v485_v28  ;;  %v1222_v36 = vmul.f32 %v1220_v1, %v486_v43 }
 0x160   : > { %v688_v62 = vadd.f32 %v686_v50, %v682_v29  ;;  %v689_v2 = vadd.f32 %v687_v49, %v683_v26  ;;  %v869_v40 = vadd.f32 %v867_v45, %v863_v3  ;;  %v870_v46 = vadd.f32 %v868_v48, %v864_v21 }
 0x161   : > { %v1046_v55 = vadd.f32 %v1044_v35, %v1040_v5  ;;  %v1047_v4 = vadd.f32 %v1045_v42, %v1041_v17  ;;  %v502_v47 = vsel %vm501_vm2, %v498_v10, %v500_v37  ;;  %v503_v7 = vsel %vm501_vm2, %v500_v37, %v498_v10 }
 0x162   : > { %v532_v12 = vsel %vm531_vm3, %v528_v18, %v530_v20  ;;  %v533_v1 = vsel %vm531_vm3, %v530_v20, %v528_v18  ;;  %v560_v26 = vpop.permute.xlu1 %559  ;;  %v558_v21 = vpop.permute.xlu0 %557  ;;  %v1223_v17 = vadd.f32 %v1221_v13, %v1217_v11  ;;  %v1224_v29 = vadd.f32 %v1222_v36, %v1218_v51 }
 0x163   : > { %v515_v30 = vmul.f32 %v2379_v8, %v503_v7  ;;  %v516_v31 = vmul.f32 %v2396_v16, %v502_v47  ;;  %v545_v42 = vmul.f32 %v2418_v24, %v533_v1  ;;  %v546_v43 = vmul.f32 %v2421_v25, %v532_v12 }
 0x164   : > { %v562_v48 = vsel %vm561_vm4, %v558_v21, %v560_v26  ;;  %v563_v18 = vsel %vm561_vm4, %v560_v26, %v558_v21  ;;  %v3382_v20 = vstv %s3378_s28  ;;  %v3384_v35 = vstv %s3379_s6  ;;  %s3413_s28 = sld [smem:[#allocation56_spill]]  ;;  %s3418_s6 = sld [smem:[#allocation57_spill]] }
 0x165   : > { %v692_v28 = vmul.f32 %v3382_v20, %v515_v30  ;;  %v3383_v37 = vmov %v3382_v20  ;;  %v873_v50 = vmul.f32 %v3384_v35, %v515_v30  ;;  %v3385_v49 = vmov %v3384_v35 }
 0x166   : > { %v693_v45 = vmul.f32 %v3383_v37, %v516_v31  ;;  %v874_v10 = vmul.f32 %v3385_v49, %v516_v31  ;;  %v3387_v63 = vstv %s3380_s3  ;;  %v3390_v11 = vstv %s3381_s8  ;;  %v590_v47 = vpop.permute.xlu1 %589  ;;  %v588_v7 = vpop.permute.xlu0 %587  ;;  %s3421_s3 = sld [smem:[#allocation58_spill]]  ;;  %s3424_s8 = sld [smem:[#allocation59_spill]] }
 0x167   : > { %v1050_v0 = vmul.f32 %v3387_v63, %v515_v30  ;;  %v3388_v3 = vmov %v3387_v63  ;;  %v1227_v51 = vmul.f32 %v3390_v11, %v515_v30  ;;  %v3391_v13 = vmov %v3390_v11 }
 0x168   : > { %v1051_v5 = vmul.f32 %v3388_v3, %v516_v31  ;;  %v1228_v36 = vmul.f32 %v3391_v13, %v516_v31  ;;  %v694_v12 = vadd.f32 %v692_v28, %v688_v62  ;;  %v695_v1 = vadd.f32 %v693_v45, %v689_v2 }
 0x169   : > { %v875_v26 = vadd.f32 %v873_v50, %v869_v40  ;;  %v876_v21 = vadd.f32 %v874_v10, %v870_v46  ;;  %v1052_v20 = vadd.f32 %v1050_v0, %v1046_v55  ;;  %v1229_v35 = vadd.f32 %v1227_v51, %v1223_v17 }
 0x16a   : > { %v1053_v37 = vadd.f32 %v1051_v5, %v1047_v4  ;;  %v1230_v49 = vadd.f32 %v1228_v36, %v1224_v29  ;;  %v3394_v63 = vstv %s3386_s26  ;;  %v3396_v11 = vstv %s3389_s14  ;;  %v620_v55 = vpop.permute.xlu1 %619  ;;  %v618_v4 = vpop.permute.xlu0 %617  ;;  %s3425_s26 = sld [smem:[#allocation60_spill]]  ;;  %s3434_s14 = sld [smem:[#allocation61_spill]] }
 0x16b   : > { %v698_v3 = vmul.f32 %v3394_v63, %v545_v42  ;;  %v3395_v39 = vmov %v3394_v63  ;;  %v879_v52 = vmul.f32 %v3396_v11, %v545_v42  ;;  %v3397_v31 = vmov %v3396_v11 }
 0x16c   : > { %v699_v30 = vmul.f32 %v3395_v39, %v546_v43  ;;  %v880_v13 = vmul.f32 %v3397_v31, %v546_v43  ;;  %v1056_v38 = vmul.f32 %v3398_v14, %v545_v42  ;;  %v1057_v25 = vmul.f32 %v3399_v53, %v546_v43 }
 0x16d   : > { %v3400_v62 = vstv %s3393_s29  ;;  %v700_v17 = vadd.f32 %v698_v3, %v694_v12  ;;  %v881_v28 = vadd.f32 %v879_v52, %v875_v26  ;;  %v3402_v5 = vrot.slane %v2408_v22, %v2254_v41  ;;  %s3436_s29 = sld [smem:[#allocation63_spill]] }
 0x16e   : > { %v1233_v2 = vmul.f32 %v3400_v62, %v545_v42  ;;  %v3401_v40 = vmov %v3400_v62  ;;  %v701_v29 = vadd.f32 %v699_v30, %v695_v1  ;;  %v882_v45 = vadd.f32 %v880_v13, %v876_v21 }
 0x16f   : > { %v1234_v46 = vmul.f32 %v3401_v40, %v546_v43  ;;  %v1058_v50 = vadd.f32 %v1056_v38, %v1052_v20  ;;  %v1059_v39 = vadd.f32 %v1057_v25, %v1053_v37  ;;  %v716_v14 = vadd.f32 %v3402_v5, %v700_v17  ;;  %v650_v20 = vpop.permute.xlu1 %649  ;;  %v648_v37 = vpop.permute.xlu0 %647 }
 0x170   : > { %v1235_v10 = vadd.f32 %v1233_v2, %v1229_v35  ;;  %v3403_v53 = vrot.slane %v2408_v22, %v2259_v44  ;;  %v3404_v43 = vrot.slane %v2411_v23, %v2254_v41  ;;  %v3405_v52 = vrot.slane %v2411_v23, %v2259_v44 }
 0x171   : > { %v1236_v0 = vadd.f32 %v1234_v46, %v1230_v49  ;;  %v3406_v25 = vrot.slane %v2425_v27, %v2254_v41  ;;  %v3408_v12 = vrot.slane %v2425_v27, %v2259_v44  ;;  %v3409_v22 = vrot.slane %v2435_v32, %v2254_v41 }
 0x172   : > { %v717_v42 = vadd.f32 %v3403_v53, %v701_v29  ;;  %v897_v51 = vadd.f32 %v3404_v43, %v881_v28  ;;  %v898_v36 = vadd.f32 %v3405_v52, %v882_v45  ;;  %v3411_v21 = vrot.slane %v2435_v32, %v2259_v44 }
 0x173   : > { %v1074_v38 = vadd.f32 %v3406_v25, %v1058_v50  ;;  %v1075_v1 = vadd.f32 %v3408_v12, %v1059_v39  ;;  %v1251_v26 = vadd.f32 %v3409_v22, %v1235_v10  ;;  %v575_v27 = vmul.f32 %v2442_v33, %v562_v48  ;;  %v460_v5 = vpop.permute.xlu1 %459  ;;  %v458_v53 = vpop.permute.xlu0 %457 }
 0x174   : > { %v1252_v23 = vadd.f32 %v3411_v21, %v1236_v0  ;;  %v576_v35 = vmul.f32 %v2445_v34, %v563_v18  ;;  %v592_v49 = vsel %vm591_vm5, %v588_v7, %v590_v47  ;;  %v593_v32 = vsel %vm591_vm5, %v590_v47, %v588_v7 }
 0x175   : > { %v605_v63 = vmul.f32 %v2480_v54, %v592_v49  ;;  %v606_v3 = vmul.f32 %v2483_v56, %v593_v32  ;;  %v622_v30 = vsel %vm621_vm6, %v618_v4, %v620_v55  ;;  %v623_v11 = vsel %vm621_vm6, %v620_v55, %v618_v4 }
 0x176   : > { %v3414_v31 = vstv %s3407_s20  ;;  %v3416_v62 = vstv %s3410_s0  ;;  %v3419_v47 = vstv %s3412_s16  ;;  %v3422_v28 = vstv %s3413_s28  ;;  %s3437_s20 = sld [smem:[#allocation64_spill]]  ;;  %s3446_s0 = sld [smem:[#allocation65_spill]] }
 0x177   : > { %v720_v48 = vmul.f32 %v3414_v31, %v575_v27  ;;  %v3415_v13 = vmov %v3414_v31  ;;  %v901_v2 = vmul.f32 %v3416_v62, %v575_v27  ;;  %v3417_v40 = vmov %v3416_v62  ;;  %s3550_s16 = sld [smem:[#allocation28_spill]] }
 0x178   : > { %v721_v18 = vmul.f32 %v3415_v13, %v576_v35  ;;  %v902_v46 = vmul.f32 %v3417_v40, %v576_v35  ;;  %v1078_v7 = vmul.f32 %v3419_v47, %v575_v27  ;;  %v3420_v17 = vmov %v3419_v47 }
 0x179   : > { %v1079_v29 = vmul.f32 %v3420_v17, %v576_v35  ;;  %v1255_v45 = vmul.f32 %v3422_v28, %v575_v27  ;;  %v3423_v50 = vmov %v3422_v28  ;;  %v722_v4 = vadd.f32 %v720_v48, %v716_v14  ;;  %v490_v28 = vpop.permute.xlu1 %489 }
 0x17a   : > { %v1256_v55 = vmul.f32 %v3423_v50, %v576_v35  ;;  %v723_v39 = vadd.f32 %v721_v18, %v717_v42  ;;  %v903_v10 = vadd.f32 %v901_v2, %v897_v51  ;;  %v904_v0 = vadd.f32 %v902_v46, %v898_v36 }
 0x17b   : > { %v1080_v43 = vadd.f32 %v1078_v7, %v1074_v38  ;;  %v1081_v52 = vadd.f32 %v1079_v29, %v1075_v1  ;;  %v1257_v25 = vadd.f32 %v1255_v45, %v1251_v26  ;;  %v3426_v22 = vstv %s3418_s6  ;;  %v488_v45 = vpop.permute.xlu0 %487 }
 0x17c   : > { %v1258_v12 = vadd.f32 %v1256_v55, %v1252_v23  ;;  %v726_v21 = vmul.f32 %v3426_v22, %v605_v63  ;;  %v3427_v49 = vmov %v3426_v22  ;;  %v3428_v32 = vstv %s3421_s3 }
 0x17d   : > { %v727_v27 = vmul.f32 %v3427_v49, %v606_v3  ;;  %v907_v31 = vmul.f32 %v3428_v32, %v605_v63  ;;  %v3429_v35 = vmov %v3428_v32  ;;  %v3430_v14 = vstv %s3424_s8  ;;  %p3552_p12 = scmp.ne.s32.totalorder %s3550_s16, 0 }
 0x17e   : > { %v908_v13 = vmul.f32 %v3429_v35, %v606_v3  ;;  %v1084_v48 = vmul.f32 %v3430_v14, %v605_v63  ;;  %v3431_v42 = vmov %v3430_v14  ;;  %v3432_v51 = vstv %s3425_s26  ;;  %s3551_s26 = sld [smem:[#allocation90_spill]] }
 0x17f   : > { %v1085_v18 = vmul.f32 %v3431_v42, %v606_v3  ;;  %v1261_v36 = vmul.f32 %v3432_v51, %v605_v63  ;;  %v3433_v62 = vmov %v3432_v51  ;;  %v728_v38 = vadd.f32 %v726_v21, %v722_v4 }
 0x180   : > { %v1262_v2 = vmul.f32 %v3433_v62, %v606_v3  ;;  %v729_v1 = vadd.f32 %v727_v27, %v723_v39  ;;  %v909_v26 = vadd.f32 %v907_v31, %v903_v10  ;;  %v910_v23 = vadd.f32 %v908_v13, %v904_v0 }
 0x181   : > { %v1086_v40 = vadd.f32 %v1084_v48, %v1080_v43  ;;  %v1087_v46 = vadd.f32 %v1085_v18, %v1081_v52  ;;  %v1263_v47 = vadd.f32 %v1261_v36, %v1257_v25  ;;  %v635_v17 = vmul.f32 %v2498_v15, %v622_v30 }
 0x182   : > { %v1264_v7 = vadd.f32 %v1262_v2, %v1258_v12  ;;  %v636_v63 = vmul.f32 %v2501_v19, %v623_v11  ;;  %v652_v3 = vsel %vm651_vm7, %v648_v37, %v650_v20  ;;  %v653_v29 = vsel %vm651_vm7, %v650_v20, %v648_v37 }
 0x183   : > { %v665_v50 = vmul.f32 %v2512_v9, %v652_v3  ;;  %v666_v55 = vmul.f32 %v2515_v6, %v653_v29  ;;  %v461_v4 = vsel %vm430_vm1, %v458_v53, %v460_v5  ;;  %v462_v30 = vsel %vm430_vm1, %v460_v5, %v458_v53 }
 0x184   : > { %v3438_v11 = vstv %s3434_s14  ;;  %v3440_v43 = vstv %s3435_s10  ;;  %v3442_v25 = vstv %s3436_s29  ;;  %v3444_v49 = vstv %s3437_s20  ;;  %s2008_s20 = smov [#allocation14]  }
 0x185   : > { %v732_v39 = vmul.f32 %v3438_v11, %v635_v17  ;;  %v3439_v10 = vmov %v3438_v11  ;;  %v913_v20 = vmul.f32 %v3440_v43, %v635_v17  ;;  %v3441_v37 = vmov %v3440_v43 }
 0x186   : > { %v733_v0 = vmul.f32 %v3439_v10, %v636_v63  ;;  %v914_v52 = vmul.f32 %v3441_v37, %v636_v63  ;;  %v1090_v12 = vmul.f32 %v3442_v25, %v635_v17  ;;  %v3443_v22 = vmov %v3442_v25  ;;  %v518_v10 = vpop.permute.xlu0 %517 }
 0x187   : > { %v1091_v21 = vmul.f32 %v3443_v22, %v636_v63  ;;  %v1267_v27 = vmul.f32 %v3444_v49, %v635_v17  ;;  %v3445_v32 = vmov %v3444_v49  ;;  %v734_v53 = vadd.f32 %v732_v39, %v728_v38 }
 0x188   : > { %v1268_v5 = vmul.f32 %v3445_v32, %v636_v63  ;;  %v735_v31 = vadd.f32 %v733_v0, %v729_v1  ;;  %v915_v35 = vadd.f32 %v913_v20, %v909_v26  ;;  %v916_v13 = vadd.f32 %v914_v52, %v910_v23  ;;  %v520_v63 = vpop.permute.xlu1 %519 }
 0x189   : > { %v1092_v14 = vadd.f32 %v1090_v12, %v1086_v40  ;;  %v1093_v48 = vadd.f32 %v1091_v21, %v1087_v46  ;;  %v1269_v42 = vadd.f32 %v1267_v27, %v1263_v47  ;;  %v3447_v51 = vstv %s2383_s19  ;;  %s3472_s19 = sld [smem:[#allocation68_spill]] }
 0x18a   : > { %v1270_v18 = vadd.f32 %v1268_v5, %v1264_v7  ;;  %v738_v36 = vmul.f32 %v3447_v51, %v665_v50  ;;  %v3448_v62 = vmov %v3447_v51  ;;  %v3449_v3 = vstv %s2385_s12  ;;  %s3509_s12 = sld [smem:[#allocation74_spill]] }
 0x18b   : > { %v739_v2 = vmul.f32 %v3448_v62, %v666_v55  ;;  %v919_v17 = vmul.f32 %v3449_v3, %v665_v50  ;;  %v3450_v29 = vmov %v3449_v3  ;;  %v3451_v38 = vstv %s3446_s0  ;;  %s1911_s0 = sshll.u32 %s2008_s20, 4  ;;  %s1912_s0 = int_to_ptr.vmem [resolvable:$false] %s1911_s0 }
 0x18c   : > { %v920_v11 = vmul.f32 %v3450_v29, %v666_v55  ;;  %v1096_v39 = vmul.f32 %v3451_v38, %v665_v50  ;;  %v3452_v1 = vmov %v3451_v38  ;;  %v3453_v26 = vstv %s2393_s15  ;;  %s3512_s15 = sld [smem:[#allocation75_spill]] }
 0x18d   : > { %v1097_v0 = vmul.f32 %v3452_v1, %v666_v55  ;;  %v1273_v23 = vmul.f32 %v3453_v26, %v665_v50  ;;  %v3454_v40 = vmov %v3453_v26  ;;  %v740_v47 = vadd.f32 %v738_v36, %v734_v53 }
 0x18e   : > { %v1274_v46 = vmul.f32 %v3454_v40, %v666_v55  ;;  %v741_v7 = vadd.f32 %v739_v2, %v735_v31  ;;  %v921_v43 = vadd.f32 %v919_v17, %v915_v35  ;;  %v922_v20 = vadd.f32 %v920_v11, %v916_v13 }
 0x18f   : > { %v1098_v37 = vadd.f32 %v1096_v39, %v1092_v14  ;;  %v1099_v52 = vadd.f32 %v1097_v0, %v1093_v48  ;;  %v1275_v25 = vadd.f32 %v1273_v23, %v1269_v42  ;;  %v463_v22 = vmul.f32 %v462_v30, %v2352_v60 }
 0x190   : > { %v1276_v12 = vadd.f32 %v1274_v46, %v1270_v18  ;;  %v464_v50 = vmul.f32 %v461_v4, %v2355_v61  ;;  %v491_v55 = vsel %vm471_vm0, %v488_v45, %v490_v28  ;;  %v492_v21 = vsel %vm471_vm0, %v490_v28, %v488_v45  ;;  %v550_v28 = vpop.permute.xlu1 %549 }
 0x191   : > { %v493_v49 = vmul.f32 %v492_v21, %v2346_v58  ;;  %v494_v27 = vmul.f32 %v491_v55, %v2349_v59  ;;  %v521_v32 = vsel %vm501_vm2, %v518_v10, %v520_v63  ;;  %v522_v60 = vsel %vm501_vm2, %v520_v63, %v518_v10  ;;  %v548_v58 = vpop.permute.xlu0 %547 }
 0x192   : > { %v3455_v30 = vstv %s2401_s22  ;;  %v3457_v53 = vstv %s2403_s23  ;;  %v3459_v59 = vstv %s2413_s24  ;;  %v3461_v42 = vstv %s2415_s7  ;;  %s3471_s7 = sld [smem:[#allocation67_spill]]  ;;  %s3516_s22 = sld [smem:[#allocation77_spill]] }
 0x193   : > { %v744_v5 = vmul.f32 %v3455_v30, %v463_v22  ;;  %v3456_v61 = vmov %v3455_v30  ;;  %v925_v31 = vmul.f32 %v3457_v53, %v463_v22  ;;  %v3458_v35 = vmov %v3457_v53  ;;  %s3527_s23 = sld [smem:[#allocation82_spill]]  ;;  %s3532_s24 = sld [smem:[#allocation83_spill]] }
 0x194   : > { %v745_v4 = vmul.f32 %v3456_v61, %v464_v50  ;;  %v926_v13 = vmul.f32 %v3458_v35, %v464_v50  ;;  %v1102_v45 = vmul.f32 %v3459_v59, %v463_v22  ;;  %v3460_v14 = vmov %v3459_v59  ;;  %v580_v30 = vpop.permute.xlu1 %579 }
 0x195   : > { %v1103_v48 = vmul.f32 %v3460_v14, %v464_v50  ;;  %v1279_v18 = vmul.f32 %v3461_v42, %v463_v22  ;;  %v3462_v51 = vmov %v3461_v42  ;;  %v746_v62 = vadd.f32 %v744_v5, %v740_v47  ;;  %v578_v5 = vpop.permute.xlu0 %577 }
 0x196   : > { %v1280_v36 = vmul.f32 %v3462_v51, %v464_v50  ;;  %v747_v2 = vadd.f32 %v745_v4, %v741_v7  ;;  %v927_v3 = vadd.f32 %v925_v31, %v921_v43  ;;  %v928_v17 = vadd.f32 %v926_v13, %v922_v20 }
 0x197   : > { %v1104_v29 = vadd.f32 %v1102_v45, %v1098_v37  ;;  %v1105_v11 = vadd.f32 %v1103_v48, %v1099_v52  ;;  %v1281_v63 = vadd.f32 %v1279_v18, %v1275_v25  ;;  %v3463_v38 = vstv %s2427_s21  ;;  %v3474_v45 = vld [vmem:[#allocation66_spill] sm:$0xff]  ;;  %s3544_s21 = sld [smem:[#allocation30_spill]] }
 0x198   : > { %v1282_v10 = vadd.f32 %v1280_v36, %v1276_v12  ;;  %v750_v39 = vmul.f32 %v3463_v38, %v493_v49  ;;  %v3464_v1 = vmov %v3463_v38  ;;  %v3465_v26 = vstv %s2429_s2  ;;  %s3473_s2 = sld [smem:[#allocation69_spill]] }
 0x199   : > { %v751_v0 = vmul.f32 %v3464_v1, %v494_v27  ;;  %v931_v23 = vmul.f32 %v3465_v26, %v493_v49  ;;  %v3466_v40 = vmov %v3465_v26  ;;  %v3467_v22 = vstv %s2437_s1  ;;  %s2911_s1 = sld [smem:[#allocation9 + $0x111]] }
 0x19a   : > { %v932_v46 = vmul.f32 %v3466_v40, %v494_v27  ;;  %v1108_v55 = vmul.f32 %v3467_v22, %v493_v49  ;;  %v3468_v50 = vmov %v3467_v22  ;;  %v3469_v47 = vstv %s2460_s27  ;;  %s2913_s27 = sld [smem:[#allocation9 + $0x191]] }
 0x19b   : > { %v1109_v21 = vmul.f32 %v3468_v50, %v494_v27  ;;  %v1285_v7 = vmul.f32 %v3469_v47, %v493_v49  ;;  %v3470_v43 = vmov %v3469_v47  ;;  %v752_v37 = vadd.f32 %v750_v39, %v746_v62 }
 0x19c   : > { %v1286_v20 = vmul.f32 %v3470_v43, %v494_v27  ;;  %v753_v52 = vadd.f32 %v751_v0, %v747_v2  ;;  %v933_v25 = vadd.f32 %v931_v23, %v927_v3  ;;  %v934_v12 = vadd.f32 %v932_v46, %v928_v17  ;;  %v610_v43 = vpop.permute.xlu1 %609 }
 0x19d   : > { %v1110_v61 = vadd.f32 %v1108_v55, %v1104_v29  ;;  %v1111_v4 = vadd.f32 %v1109_v21, %v1105_v11  ;;  %v1287_v53 = vadd.f32 %v1285_v7, %v1281_v63  ;;  %v523_v49 = vmul.f32 %v522_v60, %v2379_v8  ;;  %s1388_s10 = scalar_lea.sflag [#allocation4], %s3544_s21 }
 0x19e   : > { %v1288_v31 = vadd.f32 %v1286_v20, %v1282_v10  ;;  %v524_v27 = vmul.f32 %v521_v32, %v2396_v16  ;;  %v551_v35 = vsel %vm531_vm3, %v548_v58, %v550_v28  ;;  %v552_v13 = vsel %vm531_vm3, %v550_v28, %v548_v58  ;;  %v608_v20 = vpop.permute.xlu0 %607 }
 0x19f   : > { %v553_v59 = vmul.f32 %v552_v13, %v2418_v24  ;;  %v554_v14 = vmul.f32 %v551_v35, %v3474_v45  ;;  %v581_v48 = vsel %vm561_vm4, %v578_v5, %v580_v30  ;;  %v582_v42 = vsel %vm561_vm4, %v580_v30, %v578_v5 }
 0x1a0   : > { %v3475_v18 = vstv %s3471_s7  ;;  %v3477_v32 = vstv %s3472_s19  ;;  %v3479_v28 = vstv %s3473_s2  ;;  %v3481_v3 = vstv %s2487_s13  ;;  %s3506_s13 = sld [smem:[#allocation73_spill]]  ;;  %s1913_s7 = scalar_lea.vmem %s1912_s0, 256 }
 0x1a1   : > { %v756_v8 = vmul.f32 %v3475_v18, %v523_v49  ;;  %v3476_v60 = vmov %v3475_v18  ;;  %v937_v51 = vmul.f32 %v3477_v32, %v523_v49  ;;  %v3478_v36 = vmov %v3477_v32 }
 0x1a2   : > { %v757_v16 = vmul.f32 %v3476_v60, %v524_v27  ;;  %v938_v62 = vmul.f32 %v3478_v36, %v524_v27  ;;  %v1114_v24 = vmul.f32 %v3479_v28, %v523_v49  ;;  %v3480_v58 = vmov %v3479_v28 }
 0x1a3   : > { %v1115_v2 = vmul.f32 %v3480_v58, %v524_v27  ;;  %v1291_v17 = vmul.f32 %v3481_v3, %v523_v49  ;;  %v3482_v29 = vmov %v3481_v3  ;;  %v758_v63 = vadd.f32 %v756_v8, %v752_v37  ;;  %v3491_v8 = vld [vmem:[#allocation78_spill] sm:$0xff] }
 0x1a4   : > { %v1292_v11 = vmul.f32 %v3482_v29, %v524_v27  ;;  %v759_v10 = vadd.f32 %v757_v16, %v753_v52  ;;  %v939_v38 = vadd.f32 %v937_v51, %v933_v25  ;;  %v940_v39 = vadd.f32 %v938_v62, %v934_v12  ;;  %v3502_v29 = vld [vmem:[#allocation81_spill] sm:$0xff] }
 0x1a5   : > { %v1116_v1 = vadd.f32 %v1114_v24, %v1110_v61  ;;  %v1117_v0 = vadd.f32 %v1115_v2, %v1111_v4  ;;  %v1293_v26 = vadd.f32 %v1291_v17, %v1287_v53  ;;  %v3483_v40 = vstv %s2493_s30  ;;  %v3498_v24 = vld [vmem:[#allocation80_spill] sm:$0xff]  ;;  %s3505_s30 = sld [smem:[#allocation72_spill]] }
 0x1a6   : > { %v1294_v23 = vadd.f32 %v1292_v11, %v1288_v31  ;;  %v762_v46 = vmul.f32 %v3483_v40, %v553_v59  ;;  %v3484_v22 = vmov %v3483_v40  ;;  %v3485_v50 = vstv %s2495_s18  ;;  %s3501_s18 = sld [smem:[#allocation71_spill]]  ;;  %v638_v40 = vpop.permute.xlu0 %637 }
 0x1a7   : > { %v763_v55 = vmul.f32 %v3484_v22, %v554_v14  ;;  %v943_v21 = vmul.f32 %v3485_v50, %v553_v59  ;;  %v3486_v47 = vmov %v3485_v50  ;;  %v3487_v37 = vstv %s2505_s5  ;;  %s3497_s5 = sld [smem:[#allocation70_spill]] }
 0x1a8   : > { %v944_v7 = vmul.f32 %v3486_v47, %v554_v14  ;;  %v1120_v52 = vmul.f32 %v3487_v37, %v553_v59  ;;  %v3488_v25 = vmov %v3487_v37  ;;  %v3489_v30 = vstv %s2507_s25  ;;  %s3515_s25 = sld [smem:[#allocation76_spill]] }
 0x1a9   : > { %v1121_v12 = vmul.f32 %v3488_v25, %v554_v14  ;;  %v1297_v5 = vmul.f32 %v3489_v30, %v553_v59  ;;  %v3490_v61 = vmov %v3489_v30  ;;  %v764_v53 = vadd.f32 %v762_v46, %v758_v63  ;;  %v3494_v59 = vld [vmem:[#allocation79_spill] sm:$0xff] }
 0x1aa   : > { %v1298_v4 = vmul.f32 %v3490_v61, %v554_v14  ;;  %v765_v31 = vadd.f32 %v763_v55, %v759_v10  ;;  %v945_v49 = vadd.f32 %v943_v21, %v939_v38  ;;  %v946_v27 = vadd.f32 %v944_v7, %v940_v39 }
 0x1ab   : > { %v1122_v35 = vadd.f32 %v1120_v52, %v1116_v1  ;;  %v1123_v13 = vadd.f32 %v1121_v12, %v1117_v0  ;;  %v1299_v45 = vadd.f32 %v1297_v5, %v1293_v26  ;;  %v3492_v60 = vrot.slane %v3491_v8, %v2254_v41 }
 0x1ac   : > { %v1300_v18 = vadd.f32 %v1298_v4, %v1294_v23  ;;  %v3493_v32 = vrot.slane %v3491_v8, %v2259_v44  ;;  %v3495_v14 = vrot.slane %v3494_v59, %v2254_v41  ;;  %v3496_v62 = vrot.slane %v3494_v59, %v2259_v44  ;;  %v640_v23 = vpop.permute.xlu1 %639 }
 0x1ad   : > { %v780_v16 = vadd.f32 %v3492_v60, %v764_v53  ;;  %v3499_v58 = vrot.slane %v3498_v24, %v2254_v41  ;;  %v3500_v3 = vrot.slane %v3498_v24, %v2259_v44  ;;  %v3503_v11 = vrot.slane %v3502_v29, %v2254_v41 }
 0x1ae   : > { %v781_v51 = vadd.f32 %v3493_v32, %v765_v31  ;;  %v961_v36 = vadd.f32 %v3495_v14, %v945_v49  ;;  %v962_v28 = vadd.f32 %v3496_v62, %v946_v27  ;;  %v3504_v10 = vrot.slane %v3502_v29, %v2259_v44 }
 0x1af   : > { %v1138_v2 = vadd.f32 %v3499_v58, %v1122_v35  ;;  %v1139_v17 = vadd.f32 %v3500_v3, %v1123_v13  ;;  %v1315_v63 = vadd.f32 %v3503_v11, %v1299_v45  ;;  %v583_v39 = vmul.f32 %v581_v48, %v2442_v33 }
 0x1b0   : > { %v1316_v38 = vadd.f32 %v3504_v10, %v1300_v18  ;;  %v584_v1 = vmul.f32 %v582_v42, %v2445_v34  ;;  %v611_v0 = vsel %vm591_vm5, %v608_v20, %v610_v43  ;;  %v612_v26 = vsel %vm591_vm5, %v610_v43, %v608_v20 }
 0x1b1   : > { %v613_v46 = vmul.f32 %v611_v0, %v2480_v54  ;;  %v614_v22 = vmul.f32 %v612_v26, %v2483_v56  ;;  %v1159_v55 = vstv %s2911_s1  ;;  %v1336_v50 = vstv %s2913_s27 }
 0x1b2   : > { %v3507_v21 = vstv %s3497_s5  ;;  %v3510_v42 = vstv %s3501_s18  ;;  %v3513_v20 = vstv %s3505_s30  ;;  %v641_v56 = vsel %vm621_vm6, %v638_v40, %v640_v23 }
 0x1b3   : > { %v784_v33 = vmul.f32 %v3507_v21, %v583_v39  ;;  %v3508_v48 = vmov %v3507_v21  ;;  %v965_v47 = vmul.f32 %v3510_v42, %v583_v39  ;;  %v3511_v7 = vmov %v3510_v42 }
 0x1b4   : > { %v785_v34 = vmul.f32 %v3508_v48, %v584_v1  ;;  %v966_v43 = vmul.f32 %v3511_v7, %v584_v1  ;;  %v1142_v37 = vmul.f32 %v3513_v20, %v583_v39  ;;  %v3514_v52 = vmov %v3513_v20 }
 0x1b5   : > { %v1143_v54 = vmul.f32 %v3514_v52, %v584_v1  ;;  %v642_v25 = vsel %vm621_vm6, %v640_v23, %v638_v40  ;;  %v786_v12 = vadd.f32 %v784_v33, %v780_v16  ;;  %v3517_v5 = vstv %s3506_s13 }
 0x1b6   : > { %v787_v30 = vadd.f32 %v785_v34, %v781_v51  ;;  %v1319_v61 = vmul.f32 %v3517_v5, %v583_v39  ;;  %v3518_v4 = vmov %v3517_v5  ;;  %v967_v31 = vadd.f32 %v965_v47, %v961_v36  ;;  %v670_v36 = vpop.permute.xlu1 %669 }
 0x1b7   : > { %v1320_v53 = vmul.f32 %v3518_v4, %v584_v1  ;;  %v968_v49 = vadd.f32 %v966_v43, %v962_v28  ;;  %v1144_v27 = vadd.f32 %v1142_v37, %v1138_v2  ;;  %v1145_v35 = vadd.f32 %v1143_v54, %v1139_v17  ;;  %v668_v28 = vpop.permute.xlu0 %667 }
 0x1b8   : > { %v3519_v13 = vstv %s3509_s12  ;;  %v3521_v60 = vstv %s3512_s15  ;;  %v3523_v62 = vstv %s3515_s25  ;;  %v3525_v58 = vstv %s3516_s22 }
 0x1b9   : > { %v790_v45 = vmul.f32 %v3519_v13, %v613_v46  ;;  %v3520_v18 = vmov %v3519_v13  ;;  %v971_v32 = vmul.f32 %v3521_v60, %v613_v46  ;;  %v3522_v59 = vmov %v3521_v60 }
 0x1ba   : > { %v791_v8 = vmul.f32 %v3520_v18, %v614_v22  ;;  %v972_v14 = vmul.f32 %v3522_v59, %v614_v22  ;;  %v1148_v24 = vmul.f32 %v3523_v62, %v613_v46  ;;  %v3524_v16 = vmov %v3523_v62 }
 0x1bb   : > { %v1149_v51 = vmul.f32 %v3524_v16, %v614_v22  ;;  %v1325_v3 = vmul.f32 %v3525_v58, %v613_v46  ;;  %v3526_v29 = vmov %v3525_v58  ;;  %v1321_v2 = vadd.f32 %v1319_v61, %v1315_v63 }
 0x1bc   : > { %v1326_v11 = vmul.f32 %v3526_v29, %v614_v22  ;;  %v1322_v17 = vadd.f32 %v1320_v53, %v1316_v38  ;;  %v792_v10 = vadd.f32 %v790_v45, %v786_v12  ;;  %v793_v39 = vadd.f32 %v791_v8, %v787_v30 }
 0x1bd   : > { %v973_v1 = vadd.f32 %v971_v32, %v967_v31  ;;  %v974_v0 = vadd.f32 %v972_v14, %v968_v49  ;;  %v1150_v26 = vadd.f32 %v1148_v24, %v1144_v27  ;;  %v1151_v23 = vadd.f32 %v1149_v51, %v1145_v35 }
 0x1be   : > { %v643_v40 = vmul.f32 %v641_v56, %v2498_v15  ;;  %v644_v46 = vmul.f32 %v642_v25, %v2501_v19  ;;  %v671_v63 = vsel %vm651_vm7, %v668_v28, %v670_v36  ;;  %v672_v38 = vsel %vm651_vm7, %v670_v36, %v668_v28 }
 0x1bf   : > { %v1327_v22 = vadd.f32 %v1325_v3, %v1321_v2  ;;  %v1328_v21 = vadd.f32 %v1326_v11, %v1322_v17  ;;  %v673_v33 = vmul.f32 %v671_v63, %v2512_v9  ;;  %v674_v48 = vmul.f32 %v672_v38, %v2515_v6 }
 0x1c0   : > { %v3528_v34 = vstv %s2561_s4  ;;  %v3530_v15 = vstv %s2563_s9  ;;  %v3533_v37 = vstv %s2571_s11  ;;  %v3535_v9 = vstv %s3527_s23  ;;  %s3545_s4 = sld [smem:[#allocation25_spill]]  ;;  %s3549_s9 = sshll.u32 %s3544_s21, 3 }
 0x1c1   : > { %v796_v42 = vmul.f32 %v3528_v34, %v643_v40  ;;  %v3529_v47 = vmov %v3528_v34  ;;  %v977_v19 = vmul.f32 %v3530_v15, %v643_v40  ;;  %v3531_v43 = vmov %v3530_v15  ;;  %s334_s11 = scalar_lea.vmem [#allocation14], %s3549_s9 }
 0x1c2   : > { %v797_v7 = vmul.f32 %v3529_v47, %v644_v46  ;;  %v978_v20 = vmul.f32 %v3531_v43, %v644_v46  ;;  %v1154_v57 = vmul.f32 %v3533_v37, %v643_v40  ;;  %v3534_v52 = vmov %v3533_v37  ;;  %s1402_s6 = sshll.u32 %s334_s11, 4  ;;  %s3102_s6 = int_to_ptr.vmem [resolvable:$true] %s1402_s6 }
 0x1c3   : > { %v1155_v54 = vmul.f32 %v3534_v52, %v644_v46  ;;  %v1331_v6 = vmul.f32 %v3535_v9, %v643_v40  ;;  %v3536_v56 = vmov %v3535_v9  ;;  %v798_v12 = vadd.f32 %v796_v42, %v792_v10  ;;  %s1907_s29 = scalar_lea.vmem %s3102_s6, 128  ;;  %p1914_p1 = scmp.lt.s32.totalorder %s3102_s6, %s1912_s0 }
 0x1c4   : > { %v1332_v25 = vmul.f32 %v3536_v56, %v644_v46  ;;  %v799_v30 = vadd.f32 %v797_v7, %v793_v39  ;;  %v979_v5 = vadd.f32 %v977_v19, %v973_v1  ;;  %v980_v61 = vadd.f32 %v978_v20, %v974_v0  ;;  %p1908_p11 = scmp.ne.s32.totalorder %s3102_s6, %s1907_s29  ;;  %p1915_p13 = scmp.lt.s32.totalorder %s1913_s7, %s1907_s29 }
 0x1c5   : > { %v1156_v4 = vadd.f32 %v1154_v57, %v1150_v26  ;;  %v1157_v53 = vadd.f32 %v1155_v54, %v1151_v23  ;;  %v1333_v31 = vadd.f32 %v1331_v6, %v1327_v22  ;;  %v3537_v27 = vstv %s2579_s17  ;;  %s3541_s17 = sld [smem:[#allocation31_spill]] }
 0x1c6   : > { %v1334_v49 = vadd.f32 %v1332_v25, %v1328_v21  ;;  %v802_v35 = vmul.f32 %v3537_v27, %v673_v33  ;;  %v3538_v13 = vmov %v3537_v27  ;;  %v3539_v18 = vstv %s3532_s24  ;;  %s1639_s28 = sshll.u32 %s3545_s4, 7  ;;  %p1909_p0 = pnand %p1908_p11, %p3552_p12 }
 0x1c7   : > { %v803_v45 = vmul.f32 %v3538_v13, %v674_v48  ;;  %v983_v8 = vmul.f32 %v3539_v18, %v673_v33  ;;  %v3540_v60 = vmov %v3539_v18  ;;  %v1160_v59 = vmul.f32 %v1159_v55, %v673_v33  ;;  %v3543_v13 = vld [vmem:[#allocation52_spill] sm:$0xff]  ;;  %s3100_s14 = scalar_lea.hbm %s3551_s26, %s1639_s28  ;;  %p1916_p6 = por %p1915_p13, %p1914_p1 }
 0x1c8   : > { %v984_v32 = vmul.f32 %v3540_v60, %v674_v48  ;;  %v1161_v14 = vmul.f32 %v1159_v55, %v674_v48  ;;  %v1337_v62 = vmul.f32 %v1336_v50, %v673_v33  ;;  %v1338_v24 = vmul.f32 %v1336_v50, %v674_v48  ;;  %p1910_p2 = pneg %p1909_p0 }
 0x1c9   : > { %v3041_v16 = vadd.f32 %v802_v35, %v798_v12  ;;  %v3043_v51 = vadd.f32 %v803_v45, %v799_v30  ;;  %v3045_v58 = vadd.f32 %v983_v8, %v979_v5  ;;  %v3049_v29 = vadd.f32 %v1160_v59, %v1156_v4  ;;  %v3542_v12 = vld [vmem:[#allocation32_spill] sm:$0xff] }
 0x1ca   : > { %v3047_v3 = vadd.f32 %v984_v32, %v980_v61  ;;  %v3051_v11 = vadd.f32 %v1161_v14, %v1157_v53  ;;  %v3053_v36 = vadd.f32 %v1337_v62, %v1333_v31  ;;  %v3055_v28 = vadd.f32 %v1338_v24, %v1334_v49  ;;  %p1917_p9 = pnand %p1916_p6, %p1910_p2 }
 0x1cb   : > { %v806_v55 = vsub.f32 0.0, %v3041_v16  ;;  %v807_v50 = vsub.f32 0.0, %v3043_v51  ;;  %v987_v2 = vsub.f32 0.0, %v3045_v58  ;;  %v1164_v10 = vsub.f32 0.0, %v3049_v29  ;;  %v1788_v5 = vld [vmem:[%s3541_s17] sm:$0xff] }
 0x1cc   : > { %v988_v17 = vsub.f32 0.0, %v3047_v3  ;;  %v1165_v39 = vsub.f32 0.0, %v3051_v11  ;;  %v1341_v1 = vsub.f32 0.0, %v3053_v36  ;;  %v1342_v46 = vsub.f32 0.0, %v3055_v28 }
 0x1cd   : > { %v808_v0 = vmul.f32 1.442695, %v806_v55  ;;  %v810_v26 = vmul.f32 1.442695, %v807_v50  ;;  %v989_v23 = vmul.f32 1.442695, %v987_v2  ;;  %v824_v61 = vrot.slane %v1788_v5, %v2254_v41 }
 0x1ce   : > { %v991_v40 = vmul.f32 1.442695, %v988_v17  ;;  %v1166_v63 = vmul.f32 1.442695, %v1164_v10  ;;  %v1168_v38 = vmul.f32 1.442695, %v1165_v39  ;;  %v828_v31 = vrot.slane %v1788_v5, %v2259_v44 }
 0x1cf   : > { %1756 = vpow2.f32 %v808_v0  ;;  %v1343_v22 = vmul.f32 1.442695, %v1341_v1  ;;  %v1345_v21 = vmul.f32 1.442695, %v1342_v46  ;;  %v2007_v56 = vmov 1966171168  }
 0x1d0   : > { %1758 = vpow2.f32 %v810_v26  ;;  %v837_v25 = vunpack.c.l.s4 %v2007_v56  ;;  %v1007_v30 = vsub.s32 5, %v3542_v12  ;;  %v1180_v4 = vsub.s32 2, %v3542_v12 }
 0x1d1   : > { %1760 = vpow2.f32 %v989_v23  ;;  %v1184_v49 = vsub.s32 6, %v3542_v12  ;;  %v1004_v45 = vrot.slane %v1788_v5, %v3543_v13  ;;  %v1357_v18 = vsub.s32 3, %v3542_v12 }
 0x1d2   : > { %1762 = vpow2.f32 %v991_v40  ;;  %v838_v27 = vunpack.c.0.s8 %v837_v25  ;;  %v1008_v32 = vrot.slane %v1788_v5, %v1007_v30  ;;  %v1361_v59 = vsub.s32 7, %v3542_v12 }
 0x1d3   : > { %1764 = vpow2.f32 %v1166_v63  ;;  %v1181_v62 = vrot.slane %v1788_v5, %v1180_v4  ;;  %v1185_v50 = vrot.slane %v1788_v5, %v1184_v49 }
 0x1d4   : > { %1766 = vpow2.f32 %v1168_v38  ;;  %v841_v10 = vsub.s32 %v838_v27, %v3542_v12  ;;  %v1362_v23 = vrot.slane %v1788_v5, %v1361_v59 }
 0x1d5   : > { %1768 = vpow2.f32 %v1343_v22 }
 0x1d6   : > { %1770 = vpow2.f32 %v1345_v21 }
 0x1d9   : > { %v1757_v33 = vpop.eup %1756 }
 0x1da   : > { %v1759_v48 = vpop.eup %1758  ;;  %v812_v34 = vadd.f32 1.0, %v1757_v33 }
 0x1db   : > { %v1761_v42 = vpop.eup %1760  ;;  %v813_v47 = vadd.f32 1.0, %v1759_v48 }
 0x1dc   : > { %v1763_v7 = vpop.eup %1762  ;;  %1772 = vrcp.f32 %v812_v34  ;;  %v993_v15 = vadd.f32 1.0, %v1761_v42  ;;  %v3546_v34 = vlaneseq }
 0x1dd   : > { %v1765_v19 = vpop.eup %1764  ;;  %1774 = vrcp.f32 %v813_v47  ;;  %v994_v43 = vadd.f32 1.0, %v1763_v7 }
 0x1de   : > { %v1767_v20 = vpop.eup %1766  ;;  %1776 = vrcp.f32 %v993_v15  ;;  %v1170_v37 = vadd.f32 1.0, %v1765_v19  ;;  %vm3084_vm8 = vcmp.lt.s32.totalorder %v3546_v34, 256 }
 0x1df   : > { %v1769_v57 = vpop.eup %1768  ;;  %1778 = vrcp.f32 %v994_v43  ;;  %v1171_v52 = vadd.f32 1.0, %v1767_v20 }
 0x1e0   : > { %v1771_v54 = vpop.eup %1770  ;;  %1780 = vrcp.f32 %v1170_v37  ;;  %v1347_v9 = vadd.f32 1.0, %v1769_v57 }
 0x1e1   : > { %1782 = vrcp.f32 %v1171_v52  ;;  %v1348_v6 = vadd.f32 1.0, %v1771_v54 }
 0x1e2   : > { %1784 = vrcp.f32 %v1347_v9 }
 0x1e3   : > { %1786 = vrcp.f32 %v1348_v6 }
 0x1e6   : > { %v1773_v53 = vpop.eup %1772 }
 0x1e7   : > { %v1775_v35 = vpop.eup %1774  ;;  %v818_v8 = vmul.f32 %v1773_v53, %v3041_v16  ;;  %v1358_v16 = vrot.slane %v1788_v5, %v1357_v18 }
 0x1e8   : > { %v1777_v60 = vpop.eup %1776  ;;  %v819_v41 = vmul.f32 %v1775_v35, %v3043_v51 }
 0x1e9   : > { %v1779_v14 = vpop.eup %1778  ;;  %v831_v24 = vadd.f32 %v824_v61, %v818_v8  ;;  %v999_v44 = vmul.f32 %v1777_v60, %v3045_v58 }
 0x1ea   : > { %v1781_v55 = vpop.eup %1780  ;;  %v832_v2 = vadd.f32 %v828_v31, %v819_v41  ;;  %v1000_v17 = vmul.f32 %v1779_v14, %v3047_v3 }
 0x1eb   : > { %v1783_v39 = vpop.eup %1782  ;;  %v1011_v1 = vadd.f32 %v1004_v45, %v999_v44  ;;  %v1176_v0 = vmul.f32 %v1781_v55, %v3049_v29 }
 0x1ec   : > { %v1785_v26 = vpop.eup %1784  ;;  %v835_v51 = vcombine.low %v831_v24, %v832_v2  ;;  %v1012_v40 = vadd.f32 %v1008_v32, %v1000_v17  ;;  %v1177_v46 = vmul.f32 %v1783_v39, %v3051_v11 }
 0x1ed   : > { %v1787_v58 = vpop.eup %1786  ;;  %v1188_v63 = vadd.f32 %v1181_v62, %v1176_v0  ;;  %v1353_v38 = vmul.f32 %v1785_v26, %v3053_v36 }
 0x1ee   : > { %v1015_v3 = vcombine.low %v1011_v1, %v1012_v40  ;;  %v1189_v22 = vadd.f32 %v1185_v50, %v1177_v46  ;;  %v1354_v21 = vmul.f32 %v1787_v58, %v3055_v28  ;;  %v842_v33 = vrot.slane %v835_v51, %v841_v10 }
 0x1ef   : > { %v1365_v48 = vadd.f32 %v1358_v16, %v1353_v38 }
 0x1f0   : > { %v1192_v42 = vcombine.low %v1188_v63, %v1189_v22  ;;  %v1366_v47 = vadd.f32 %v1362_v23, %v1354_v21  ;;  %v849_v7 = vrot.slane %v842_v33, %v841_v10  ;;  %v1022_v11 = vrot.slane %v1015_v3, %v841_v10 }
 0x1f2   : > { %v1369_v15 = vcombine.low %v1365_v48, %v1366_v47  ;;  %855 = vst.msk [vmem:[%s334_s11] ss:$4 sm:$0x3] %vm3084_vm8, %v849_v7  ;;  %v1029_v36 = vrot.slane %v1022_v11, %v841_v10  ;;  %v1199_v28 = vrot.slane %v1192_v42, %v841_v10 }
 0x1f4   : > { %1592 = vst.msk [vmem:[%s334_s11 + $0x1] ss:$4 sm:$0x3] %vm3084_vm8, %v1029_v36  ;;  %v1206_v19 = vrot.slane %v1199_v28, %v841_v10  ;;  %v1376_v43 = vrot.slane %v1369_v15, %v841_v10 }
 0x1f6   : > { %1612 = vst.msk [vmem:[%s334_s11 + $0x2] ss:$4 sm:$0x3] %vm3084_vm8, %v1206_v19  ;;  %v1383_v20 = vrot.slane %v1376_v43, %v841_v10 }
 0x1f8   : > { %1632 = vst.msk [vmem:[%s334_s11 + $0x3] ss:$4 sm:$0x3] %vm3084_vm8, %v1383_v20 }
 0x1f9   : > { %1920 = shalt.err (!%p1917_p9)
}
 0x1fa   : > { %s1921_s19 = scalar_lea.hbm %s3100_s14, 128  ;;  %s1925_s27 = scalar_lea.hbm %s3551_s26, 256 }
 0x1fb   : > { %p1922_p10 = scmp.ne.s32.totalorder %s3100_s14, %s1921_s19  ;;  %p1926_p5 = scmp.lt.u32.totalorder %s3100_s14, %s3551_s26 }
 0x1fc   : > { %p1927_p4 = scmp.lt.u32.totalorder %s1925_s27, %s1921_s19  ;;  %p1929_p11 = scmp.lt.u32.totalorder %s1921_s19, %s3100_s14 }
 0x1fd   : > { %p1923_p8 = pnand %p1922_p10, %p3552_p12 }
 0x1fe   : > { %p1928_p7 = por %p1927_p4, %p1926_p5 }
 0x1ff   : > { %p1924_p3 = pneg %p1923_p8 }
 0x200   : > { %p1930_p0 = por %p1929_p11, %p1928_p7 }
 0x202   : > { %p1931_p2 = pnand %p1930_p0, %p1924_p3 }
 0x204   : > { %1934 = shalt.err (!%p1931_p2)
}
 0x205   : > { %1662 = dma.vmem_to_hbm [thread:$0]  (%p3552_p12), %s3102_s6, 128, %s3100_s14, %s1388_s10  }
 0x206 PF: > { %s3553_s30 = sld [smem:[#allocation21_spill]]  ;;  %s3554_s13 = sld [smem:[#allocation29_spill]] }
 0x207   : > { %s3555_s12 = sld [smem:[#allocation24_spill]] }
 0x20c   : > { %s1414_s15 = sand.u32 1, %s3553_s30   ;;  %p3556_p1 = scmp.ne.s32.totalorder %s3554_s13, 0 }
 0x20d   : > { %p3557_p13 = scmp.ge.s32.totalorder %s3555_s12, 2  ;;  %s1415_s25 = scalar_lea.sflag [#allocation4], %s1414_s15 }
 0x20f   : > { %p1685_p6 = pnand %p3557_p13, %p3556_p1 }
 0x211   : > { %1972 = dma.done.wait (!%p1685_p6), %s1415_s25, 128  }
 0x212   : > { %1974 = vsyncadd (!%p1685_p6), %s1415_s25, 4294967168  ;;  %s3558_s24 = sld [smem:[#allocation26_spill]]  ;;  %s3559_s21 = sld [smem:[#allocation22_spill]] }
 0x213   : > { %s3560_s22 = sld [smem:[#allocation23_spill]]  ;;  %s3561_s23 = sld [smem:[#allocation27_spill]] }
 0x218   : > { %p23_p9 = scmp.ge.s32.totalorder %s3558_s24, 4  }
 0x21a   :  { %25 = sbr.rel (!%p23_p9) target bundleno = 17 (0x11), region = 120 }
 0x221   :  { %1420 = vsyncpa [#allocation3], 1 }
 0x222   :  { %1422 = vsyncpa [#allocation3 + $0x1], 1 }
 0x223   :  { %1423 = vsyncpa [#allocation13], 1 }
 0x224   :  { %1424 = vsyncpa [#allocation4], 1 }
 0x225   :  { %1426 = vsyncpa [#allocation4 + $0x1], 1 }
 0x226   :  { %1427 = vsyncpa [#allocation5], 1 }
 0x227   :  { %1429 = vsyncpa [#allocation5 + $0x1], 1 }
 0x228   :  { %1430 = vsyncpa [#allocation8], 1 }
 0x229   :  { %1431 = vsyncpa [#allocation11], 1 }

</bundles_post_ra>
